<compile_context>
chip_gen: v7x
topology: tpu7x:2x2x1
jax: 0.10.0
libtpu: 0.0.40
codegen_flags: <defaults>
</compile_context>

<pallas_src>
import jax
import jax.numpy as jnp
import numpy as np
from jax import lax
from jax.experimental import pallas as pl
from jax.experimental.pallas import tpu as pltpu


# ----------------------------------------------------------------------------
# Fused per-batch-element decoder kernel:
#   embed -> LSTM recurrence -> attention -> Wc/tanh -> output projection
# ----------------------------------------------------------------------------
def decoder_kernel(x_ref,                        # (1, T, 1)  int32 token ids
                   emb_ref,                      # (V, D)
                   h0_ref, c0_ref,               # (1, 1, H)
                   wih_ref, whh_ref, b_ref,      # (D, 4H), (H, 4H), (1, 4H)  gates i,f,o,g
                   enc_ref,                      # (1, S, H)
                   wa_ref, ba_ref,               # (H, H), (1, H)
                   wwc_c_ref, wwc_h_ref, bwc_ref,  # (H, H), (H, H), (1, H)
                   wout_ref, bout_ref,           # (H, V), (1, V)
                   logits_ref,                   # out (1, T, V)
                   hT_ref, cT_ref):              # out (1, 1, H)
    f32 = jnp.float32
    T = x_ref.shape[1]
    V, D = emb_ref.shape
    H = h0_ref.shape[-1]

    # ---- Embedding gather + hoisted input projection (one MXU pass each) ----------
    # V is tiny (64) so the gather is a one-hot matmul: dense MXU work, no dynamic
    # VMEM indexing.  Out-of-range ids would silently map to a zero row; inputs here
    # are trusted (add a pl.debug_check if they are not).
    # TODO(synk): for a real vocabulary, keep emb_table in memory_space=pl.ANY and do
    # a DMA row-gather instead of the one-hot matmul.
    tok = x_ref[0]                                                       # (T, 1) int32
    onehot = (lax.broadcasted_iota(jnp.int32, (T, V), 1) == tok).astype(f32)
    xg = jnp.dot(onehot, emb_ref[...], preferred_element_type=f32)       # (T, D)
    xproj = (jnp.dot(xg, wih_ref[...], preferred_element_type=f32)
             + b_ref[...])                                               # (T, 4H)
    # Pre-split per-step rows so the sublane extraction is hoisted off the recurrence.
    xp = [xproj[t:t + 1, :] for t in range(T)]                           # T x (1, 4H)

    # ---- LSTM recurrence (fully unrolled; gate order i | f | o | g) ----------------
    # No VMEM stores inside the loop: h/c and the per-step outputs live in vregs.
    whh = whh_ref[...]
    h = h0_ref[0]                                                        # (1, H)
    c = c0_ref[0]
    hs = []
    for t in range(T):
        gates = jnp.dot(h, whh, preferred_element_type=f32) + xp[t]      # (1, 4H)
        sig = jax.nn.sigmoid(gates[:, :3 * H])                           # i | f | o
        g = jnp.tanh(gates[:, 3 * H:])                                   # g
        # TODO(synk): if the bundle dump shows these lane extracts lowering to VPU
        # masked selects (not XLU rotates), realign with pltpu.roll instead.
        c = sig[:, H:2 * H] * c + sig[:, :H] * g
        h = sig[:, 2 * H:3 * H] * jnp.tanh(c)
        hs.append(h)
    hT_ref[...] = h[None]
    cT_ref[...] = c[None]

    # Decoder states gathered straight from vregs (no scratch round-trip).
    hts = jnp.concatenate(hs, axis=0)                                    # (T, H)

    # ---- Attention head for this batch element -------------------------------------
    enc = enc_ref[0]                                                     # (S, H)
    whs = jnp.dot(enc, wa_ref[...], preferred_element_type=f32) + ba_ref[...]   # (S, H)
    score = lax.dot_general(hts, whs, (((1,), (1,)), ((), ())),
                            preferred_element_type=f32)                  # (T, S)
    m = jnp.max(score, axis=-1, keepdims=True)
    e = jnp.exp(score - m)
    denom = jnp.sum(e, axis=-1, keepdims=True)
    w = e * pl.reciprocal(denom)              # exact reciprocal: free here, tighter parity
    ctx = jnp.dot(w, enc, preferred_element_type=f32)                    # (T, H)

    # wc(cat(context, ht)) == context @ Wc_ctx + ht @ Wc_ht + bwc
    pre = (jnp.dot(ctx, wwc_c_ref[...], preferred_element_type=f32)
           + jnp.dot(hts, wwc_h_ref[...], preferred_element_type=f32)
           + bwc_ref[...])
    h2 = jnp.tanh(pre)
    # One contiguous (T, V) slab store.
    # TODO(synk): if V grows past 64, pad wout/bout/logits to a multiple of 128 lanes
    # (slice in the wrapper) so this store is an unmasked lane-dense vst, and tile the
    # output projection over a V grid axis sized for v7x's 32 MiB scoped VMEM.
    logits_ref[...] = (jnp.dot(h2, wout_ref[...], preferred_element_type=f32)
                       + bout_ref[...])[None]


# ----------------------------------------------------------------------------
# Wrapper
# ----------------------------------------------------------------------------
def _batch_block(*shape):
    """Block indexed by the batch grid axis; the non-batch dims are taken whole."""
    return pl.BlockSpec((1,) + shape, lambda b: (b,) + (0,) * len(shape))


def _const_block(*shape):
    """Whole-array block, same for every grid step (weights)."""
    return pl.BlockSpec(shape, lambda b: (0,) * len(shape))


def _reorder_gates(w):
    """Permute the packed-gate axis from PyTorch (i,f,g,o) to kernel (i,f,o,g)."""
    h4 = w.shape[-1]
    h = h4 // 4
    return jnp.concatenate([w[..., :2 * h], w[..., 3 * h:], w[..., 2 * h:3 * h]],
                           axis=-1)


@jax.jit
def decoder_forward(params, x, init_state, encoder_output):
    """Mirrors Decoder.forward(x, init_state, encoder_output)."""
    h0, c0 = init_state                         # each (1, B, H)
    T, B = x.shape
    S = encoder_output.shape[0]
    H = h0.shape[-1]
    V, D = params["emb_table"].shape

    # Kernel-layout parameter / input prep (tiny, once per call).
    wih = _reorder_gates(params["wih"])
    whh = _reorder_gates(params["whh"])
    b_lstm = _reorder_gates(params["b_lstm"])
    x_b = jnp.swapaxes(x, 0, 1)[..., None]              # (B, T, 1) int32
    h0_b = jnp.swapaxes(h0, 0, 1)                       # (B, 1, H)
    c0_b = jnp.swapaxes(c0, 0, 1)                       # (B, 1, H)
    enc_b = jnp.swapaxes(encoder_output, 0, 1)          # (B, S, H)

    # One program per batch element.  "parallel" lets v7x's two TensorCores split the
    # batch; on single-TC v5e/v6e the B programs run back-to-back.
    logits_b, hT_b, cT_b = pl.pallas_call(
        decoder_kernel,
        grid=(B,),
        in_specs=[
            _batch_block(T, 1),            # token ids
            _const_block(V, D),            # embedding table
            _batch_block(1, H),            # h0
            _batch_block(1, H),            # c0
            _const_block(D, 4 * H),        # W_ih
            _const_block(H, 4 * H),        # W_hh
            _const_block(1, 4 * H),        # combined LSTM bias
            _batch_block(S, H),            # encoder states
            _const_block(H, H),            # W_a
            _const_block(1, H),            # b_a
            _const_block(H, H),            # W_c (context half)
            _const_block(H, H),            # W_c (lstm-output half)
            _const_block(1, H),            # b_c
            _const_block(H, V),            # W_out
            _const_block(1, V),            # b_out
        ],
        out_specs=(
            _batch_block(T, V),            # logits
            _batch_block(1, H),            # h_T
            _batch_block(1, H),            # c_T
        ),
        out_shape=(
            jax.ShapeDtypeStruct((B, T, V), jnp.float32),
            jax.ShapeDtypeStruct((B, 1, H), jnp.float32),
            jax.ShapeDtypeStruct((B, 1, H), jnp.float32),
        ),
        compiler_params=pltpu.CompilerParams(
            dimension_semantics=("parallel",)),
    )(x_b, params["emb_table"], h0_b, c0_b, wih, whh, b_lstm,
      enc_b, params["wa"], params["ba"],
      params["wwc_c"], params["wwc_h"], params["bwc"],
      params["wout"], params["bout"])

    logits = jnp.swapaxes(logits_b, 0, 1)               # (T, B, V)
    hT = jnp.swapaxes(hT_b, 0, 1)                       # (1, B, H)
    cT = jnp.swapaxes(cT_b, 0, 1)                       # (1, B, H)
    return logits, (hT, cT)


# ----------------------------------------------------------------------------
# Pure-JAX reference (for correctness check only)
# ----------------------------------------------------------------------------
def reference_forward(params, x, init_state, encoder_output):
    h0, c0 = init_state
    emb = params["emb_table"][x]
    wih, whh, b = params["wih"], params["whh"], params["b_lstm"]
    H = h0.shape[-1]

    def step(carry, x_t):
        h, c = carry
        gates = x_t @ wih + h @ whh + b
        i = jax.nn.sigmoid(gates[:, 0 * H:1 * H])
        f = jax.nn.sigmoid(gates[:, 1 * H:2 * H])
        g = jnp.tanh(gates[:, 2 * H:3 * H])
        o = jax.nn.sigmoid(gates[:, 3 * H:4 * H])
        c = f * c + i * g
        h = o * jnp.tanh(c)
        return (h, c), h

    (hT, cT), out_lstm = lax.scan(step, (h0[0], c0[0]), emb)
    whs = encoder_output @ params["wa"] + params["ba"]                 # (S, B, H)
    score = jnp.einsum('tbh,sbh->bts', out_lstm, whs)
    w = jax.nn.softmax(score, axis=-1)
    context = jnp.einsum('bts,sbh->tbh', w, encoder_output)
    ctx = context @ params["wwc_c"] + out_lstm @ params["wwc_h"] + params["bwc"]
    h2 = jnp.tanh(ctx)
    logits = h2 @ params["wout"] + params["bout"]
    return logits, (hT[None], cT[None])


# ----------------------------------------------------------------------------
# Main
# ----------------------------------------------------------------------------
if __name__ == "__main__":
    T, S, B = 8, 10, 2          # target seq len, source seq len, batch
    V, D, H = 64, 16, 32        # vocab size, embedding dim, hidden dim

    key = jax.random.PRNGKey(0)
    ks = jax.random.split(key, 16)

    def init(k, shape, scale=0.1):
        return (scale * jax.random.normal(k, shape)).astype(jnp.float32)

    params = {
        "emb_table": init(ks[0], (V, D), 1.0),
        # LSTM weights stored pre-transposed: x @ wih, h @ whh ; combined bias
        # (PyTorch packed gate order i, f, g, o).
        "wih": init(ks[1], (D, 4 * H)),
        "whh": init(ks[2], (H, 4 * H)),
        "b_lstm": init(ks[3], (1, 4 * H)),
        # attention_layer weight (transposed) and bias
        "wa": init(ks[4], (H, H)),
        "ba": init(ks[5], (1, H)),
        # wc linear split into the context half and the lstm-output half of the cat
        "wwc_c": init(ks[6], (H, H)),
        "wwc_h": init(ks[7], (H, H)),
        "bwc": init(ks[8], (1, H)),
        # output projection
        "wout": init(ks[9], (H, V)),
        "bout": init(ks[10], (1, V)),
    }

    x = jax.random.randint(ks[11], (T, B), 0, V, dtype=jnp.int32)
    h0 = init(ks[12], (1, B, H), 1.0)
    c0 = init(ks[13], (1, B, H), 1.0)
    encoder_output = init(ks[14], (S, B, H), 1.0)

    logits, (hT, cT) = decoder_forward(params, x, (h0, c0), encoder_output)
    jax.block_until_ready(logits)

    ref_logits, (ref_hT, ref_cT) = reference_forward(params, x, (h0, c0), encoder_output)
    np.testing.assert_allclose(np.asarray(hT), np.asarray(ref_hT), rtol=1e-4, atol=1e-4)
    np.testing.assert_allclose(np.asarray(cT), np.asarray(ref_cT), rtol=1e-4, atol=1e-4)
    np.testing.assert_allclose(np.asarray(logits), np.asarray(ref_logits), rtol=1e-4, atol=1e-4)

    print("KERNEL_OK")
</pallas_src>

<mosaic_0001>
module attributes {stable_mosaic.version = 11 : i64} {
  func.func @decoder_kernel(%arg0: i32, %arg1: memref<1x8x1xi32, #tpu.memory_space<vmem>>, %arg2: memref<64x16xf32, #tpu.memory_space<vmem>>, %arg3: memref<1x1x32xf32, #tpu.memory_space<vmem>>, %arg4: memref<1x1x32xf32, #tpu.memory_space<vmem>>, %arg5: memref<16x128xf32, #tpu.memory_space<vmem>>, %arg6: memref<32x128xf32, #tpu.memory_space<vmem>>, %arg7: memref<1x128xf32, #tpu.memory_space<vmem>>, %arg8: memref<1x10x32xf32, #tpu.memory_space<vmem>>, %arg9: memref<32x32xf32, #tpu.memory_space<vmem>>, %arg10: memref<1x32xf32, #tpu.memory_space<vmem>>, %arg11: memref<32x32xf32, #tpu.memory_space<vmem>>, %arg12: memref<32x32xf32, #tpu.memory_space<vmem>>, %arg13: memref<1x32xf32, #tpu.memory_space<vmem>>, %arg14: memref<32x64xf32, #tpu.memory_space<vmem>>, %arg15: memref<1x64xf32, #tpu.memory_space<vmem>>, %arg16: memref<1x8x64xf32, #tpu.memory_space<vmem>>, %arg17: memref<1x1x32xf32, #tpu.memory_space<vmem>>, %arg18: memref<1x1x32xf32, #tpu.memory_space<vmem>>) attributes {dimension_semantics = [#tpu.dimension_semantics<parallel>], iteration_bounds = array<i64: 2>, scalar_prefetch = 0 : i64, scratch_operands = 0 : i64, tpu.core_type = #tpu.core_type<tc>, window_params = [{transform_indices = @transform_0, window_bounds = array<i64: 1, 8, 1>}, {pipeline_mode = #tpu.pipeline_mode<synchronous>, transform_indices = @transform_1, window_bounds = array<i64: 64, 16>}, {transform_indices = @transform_2, window_bounds = array<i64: 1, 1, 32>}, {transform_indices = @transform_3, window_bounds = array<i64: 1, 1, 32>}, {pipeline_mode = #tpu.pipeline_mode<synchronous>, transform_indices = @transform_4, window_bounds = array<i64: 16, 128>}, {pipeline_mode = #tpu.pipeline_mode<synchronous>, transform_indices = @transform_5, window_bounds = array<i64: 32, 128>}, {pipeline_mode = #tpu.pipeline_mode<synchronous>, transform_indices = @transform_6, window_bounds = array<i64: 1, 128>}, {transform_indices = @transform_7, window_bounds = array<i64: 1, 10, 32>}, {pipeline_mode = #tpu.pipeline_mode<synchronous>, transform_indices = @transform_8, window_bounds = array<i64: 32, 32>}, {pipeline_mode = #tpu.pipeline_mode<synchronous>, transform_indices = @transform_9, window_bounds = array<i64: 1, 32>}, {pipeline_mode = #tpu.pipeline_mode<synchronous>, transform_indices = @transform_10, window_bounds = array<i64: 32, 32>}, {pipeline_mode = #tpu.pipeline_mode<synchronous>, transform_indices = @transform_11, window_bounds = array<i64: 32, 32>}, {pipeline_mode = #tpu.pipeline_mode<synchronous>, transform_indices = @transform_12, window_bounds = array<i64: 1, 32>}, {pipeline_mode = #tpu.pipeline_mode<synchronous>, transform_indices = @transform_13, window_bounds = array<i64: 32, 64>}, {pipeline_mode = #tpu.pipeline_mode<synchronous>, transform_indices = @transform_14, window_bounds = array<i64: 1, 64>}, {transform_indices = @transform_15, window_bounds = array<i64: 1, 8, 64>}, {transform_indices = @transform_16, window_bounds = array<i64: 1, 1, 32>}, {transform_indices = @transform_17, window_bounds = array<i64: 1, 1, 32>}]} {
    %c0 = arith.constant 0 : index
    %c0_0 = arith.constant 0 : index
    %c0_1 = arith.constant 0 : index
    %0 = vector.load %arg1[%c0, %c0_0, %c0_1] : memref<1x8x1xi32, #tpu.memory_space<vmem>>, vector<1x8x1xi32>
    %1 = vector.shape_cast %0 : vector<1x8x1xi32> to vector<8x1xi32>
    %2 = tpu.iota {dimensions = array<i32: 1>} : vector<8x64xi32>
    %3 = vector.broadcast %1 : vector<8x1xi32> to vector<8x64xi32>
    %4 = arith.cmpi eq, %2, %3 : vector<8x64xi32>
    %5 = arith.extui %4 : vector<8x64xi1> to vector<8x64xi32>
    %6 = arith.sitofp %5 : vector<8x64xi32> to vector<8x64xf32>
    %c0_2 = arith.constant 0 : index
    %c0_3 = arith.constant 0 : index
    %7 = vector.load %arg2[%c0_2, %c0_3] : memref<64x16xf32, #tpu.memory_space<vmem>>, vector<64x16xf32>
    %cst = arith.constant dense<0.000000e+00> : vector<8x16xf32>
    %8 = tpu.matmul %6, %7, %cst {dimension_numbers = #tpu.dot_dimension_numbers<[1], [0], [0], [1], [0, 0, 1, 1], [], []>} : vector<8x64xf32>, vector<64x16xf32>, vector<8x16xf32> -> vector<8x16xf32>
    %c0_4 = arith.constant 0 : index
    %c0_5 = arith.constant 0 : index
    %9 = vector.load %arg5[%c0_4, %c0_5] : memref<16x128xf32, #tpu.memory_space<vmem>>, vector<16x128xf32>
    %cst_6 = arith.constant dense<0.000000e+00> : vector<8x128xf32>
    %10 = tpu.matmul %8, %9, %cst_6 {dimension_numbers = #tpu.dot_dimension_numbers<[1], [0], [0], [1], [0, 0, 1, 1], [], []>} : vector<8x16xf32>, vector<16x128xf32>, vector<8x128xf32> -> vector<8x128xf32>
    %c0_7 = arith.constant 0 : index
    %c0_8 = arith.constant 0 : index
    %11 = vector.load %arg7[%c0_7, %c0_8] : memref<1x128xf32, #tpu.memory_space<vmem>>, vector<1x128xf32>
    %12 = vector.broadcast %11 : vector<1x128xf32> to vector<8x128xf32>
    %13 = arith.addf %10, %12 : vector<8x128xf32>
    %14 = vector.extract_strided_slice %13 {offsets = [0, 0], sizes = [1, 128], strides = [1, 1]} : vector<8x128xf32> to vector<1x128xf32>
    %15 = vector.extract_strided_slice %13 {offsets = [1, 0], sizes = [1, 128], strides = [1, 1]} : vector<8x128xf32> to vector<1x128xf32>
    %16 = vector.extract_strided_slice %13 {offsets = [2, 0], sizes = [1, 128], strides = [1, 1]} : vector<8x128xf32> to vector<1x128xf32>
    %17 = vector.extract_strided_slice %13 {offsets = [3, 0], sizes = [1, 128], strides = [1, 1]} : vector<8x128xf32> to vector<1x128xf32>
    %18 = vector.extract_strided_slice %13 {offsets = [4, 0], sizes = [1, 128], strides = [1, 1]} : vector<8x128xf32> to vector<1x128xf32>
    %19 = vector.extract_strided_slice %13 {offsets = [5, 0], sizes = [1, 128], strides = [1, 1]} : vector<8x128xf32> to vector<1x128xf32>
    %20 = vector.extract_strided_slice %13 {offsets = [6, 0], sizes = [1, 128], strides = [1, 1]} : vector<8x128xf32> to vector<1x128xf32>
    %21 = vector.extract_strided_slice %13 {offsets = [7, 0], sizes = [1, 128], strides = [1, 1]} : vector<8x128xf32> to vector<1x128xf32>
    %c0_9 = arith.constant 0 : index
    %c0_10 = arith.constant 0 : index
    %22 = vector.load %arg6[%c0_9, %c0_10] : memref<32x128xf32, #tpu.memory_space<vmem>>, vector<32x128xf32>
    %c0_11 = arith.constant 0 : index
    %c0_12 = arith.constant 0 : index
    %c0_13 = arith.constant 0 : index
    %23 = vector.load %arg3[%c0_11, %c0_12, %c0_13] : memref<1x1x32xf32, #tpu.memory_space<vmem>>, vector<1x1x32xf32>
    %24 = vector.shape_cast %23 : vector<1x1x32xf32> to vector<1x32xf32>
    %c0_14 = arith.constant 0 : index
    %c0_15 = arith.constant 0 : index
    %c0_16 = arith.constant 0 : index
    %25 = vector.load %arg4[%c0_14, %c0_15, %c0_16] : memref<1x1x32xf32, #tpu.memory_space<vmem>>, vector<1x1x32xf32>
    %26 = vector.shape_cast %25 : vector<1x1x32xf32> to vector<1x32xf32>
    %cst_17 = arith.constant dense<0.000000e+00> : vector<1x128xf32>
    %27 = tpu.matmul %24, %22, %cst_17 {dimension_numbers = #tpu.dot_dimension_numbers<[1], [0], [0], [1], [0, 0, 1, 1], [], []>} : vector<1x32xf32>, vector<32x128xf32>, vector<1x128xf32> -> vector<1x128xf32>
    %28 = arith.addf %27, %14 : vector<1x128xf32>
    %29 = vector.extract_strided_slice %28 {offsets = [0, 0], sizes = [1, 96], strides = [1, 1]} : vector<1x128xf32> to vector<1x96xf32>
    %30 = arith.negf %29 : vector<1x96xf32>
    %31 = math.exp %30 : vector<1x96xf32>
    %cst_18 = arith.constant 1.000000e+00 : f32
    %32 = vector.broadcast %cst_18 : f32 to vector<1x96xf32>
    %33 = arith.addf %32, %31 : vector<1x96xf32>
    %34 = arith.divf %32, %33 : vector<1x96xf32>
    %35 = vector.extract_strided_slice %28 {offsets = [0, 96], sizes = [1, 32], strides = [1, 1]} : vector<1x128xf32> to vector<1x32xf32>
    %36 = math.tanh %35 : vector<1x32xf32>
    %37 = vector.extract_strided_slice %34 {offsets = [0, 32], sizes = [1, 32], strides = [1, 1]} : vector<1x96xf32> to vector<1x32xf32>
    %38 = arith.mulf %37, %26 : vector<1x32xf32>
    %39 = vector.extract_strided_slice %34 {offsets = [0, 0], sizes = [1, 32], strides = [1, 1]} : vector<1x96xf32> to vector<1x32xf32>
    %40 = arith.mulf %39, %36 : vector<1x32xf32>
    %41 = arith.addf %38, %40 : vector<1x32xf32>
    %42 = vector.extract_strided_slice %34 {offsets = [0, 64], sizes = [1, 32], strides = [1, 1]} : vector<1x96xf32> to vector<1x32xf32>
    %43 = math.tanh %41 : vector<1x32xf32>
    %44 = arith.mulf %42, %43 : vector<1x32xf32>
    %cst_19 = arith.constant dense<0.000000e+00> : vector<1x128xf32>
    %45 = tpu.matmul %44, %22, %cst_19 {dimension_numbers = #tpu.dot_dimension_numbers<[1], [0], [0], [1], [0, 0, 1, 1], [], []>} : vector<1x32xf32>, vector<32x128xf32>, vector<1x128xf32> -> vector<1x128xf32>
    %46 = arith.addf %45, %15 : vector<1x128xf32>
    %47 = vector.extract_strided_slice %46 {offsets = [0, 0], sizes = [1, 96], strides = [1, 1]} : vector<1x128xf32> to vector<1x96xf32>
    %48 = arith.negf %47 : vector<1x96xf32>
    %49 = math.exp %48 : vector<1x96xf32>
    %cst_20 = arith.constant 1.000000e+00 : f32
    %50 = vector.broadcast %cst_20 : f32 to vector<1x96xf32>
    %51 = arith.addf %50, %49 : vector<1x96xf32>
    %52 = arith.divf %50, %51 : vector<1x96xf32>
    %53 = vector.extract_strided_slice %46 {offsets = [0, 96], sizes = [1, 32], strides = [1, 1]} : vector<1x128xf32> to vector<1x32xf32>
    %54 = math.tanh %53 : vector<1x32xf32>
    %55 = vector.extract_strided_slice %52 {offsets = [0, 32], sizes = [1, 32], strides = [1, 1]} : vector<1x96xf32> to vector<1x32xf32>
    %56 = arith.mulf %55, %41 : vector<1x32xf32>
    %57 = vector.extract_strided_slice %52 {offsets = [0, 0], sizes = [1, 32], strides = [1, 1]} : vector<1x96xf32> to vector<1x32xf32>
    %58 = arith.mulf %57, %54 : vector<1x32xf32>
    %59 = arith.addf %56, %58 : vector<1x32xf32>
    %60 = vector.extract_strided_slice %52 {offsets = [0, 64], sizes = [1, 32], strides = [1, 1]} : vector<1x96xf32> to vector<1x32xf32>
    %61 = math.tanh %59 : vector<1x32xf32>
    %62 = arith.mulf %60, %61 : vector<1x32xf32>
    %cst_21 = arith.constant dense<0.000000e+00> : vector<1x128xf32>
    %63 = tpu.matmul %62, %22, %cst_21 {dimension_numbers = #tpu.dot_dimension_numbers<[1], [0], [0], [1], [0, 0, 1, 1], [], []>} : vector<1x32xf32>, vector<32x128xf32>, vector<1x128xf32> -> vector<1x128xf32>
    %64 = arith.addf %63, %16 : vector<1x128xf32>
    %65 = vector.extract_strided_slice %64 {offsets = [0, 0], sizes = [1, 96], strides = [1, 1]} : vector<1x128xf32> to vector<1x96xf32>
    %66 = arith.negf %65 : vector<1x96xf32>
    %67 = math.exp %66 : vector<1x96xf32>
    %cst_22 = arith.constant 1.000000e+00 : f32
    %68 = vector.broadcast %cst_22 : f32 to vector<1x96xf32>
    %69 = arith.addf %68, %67 : vector<1x96xf32>
    %70 = arith.divf %68, %69 : vector<1x96xf32>
    %71 = vector.extract_strided_slice %64 {offsets = [0, 96], sizes = [1, 32], strides = [1, 1]} : vector<1x128xf32> to vector<1x32xf32>
    %72 = math.tanh %71 : vector<1x32xf32>
    %73 = vector.extract_strided_slice %70 {offsets = [0, 32], sizes = [1, 32], strides = [1, 1]} : vector<1x96xf32> to vector<1x32xf32>
    %74 = arith.mulf %73, %59 : vector<1x32xf32>
    %75 = vector.extract_strided_slice %70 {offsets = [0, 0], sizes = [1, 32], strides = [1, 1]} : vector<1x96xf32> to vector<1x32xf32>
    %76 = arith.mulf %75, %72 : vector<1x32xf32>
    %77 = arith.addf %74, %76 : vector<1x32xf32>
    %78 = vector.extract_strided_slice %70 {offsets = [0, 64], sizes = [1, 32], strides = [1, 1]} : vector<1x96xf32> to vector<1x32xf32>
    %79 = math.tanh %77 : vector<1x32xf32>
    %80 = arith.mulf %78, %79 : vector<1x32xf32>
    %cst_23 = arith.constant dense<0.000000e+00> : vector<1x128xf32>
    %81 = tpu.matmul %80, %22, %cst_23 {dimension_numbers = #tpu.dot_dimension_numbers<[1], [0], [0], [1], [0, 0, 1, 1], [], []>} : vector<1x32xf32>, vector<32x128xf32>, vector<1x128xf32> -> vector<1x128xf32>
    %82 = arith.addf %81, %17 : vector<1x128xf32>
    %83 = vector.extract_strided_slice %82 {offsets = [0, 0], sizes = [1, 96], strides = [1, 1]} : vector<1x128xf32> to vector<1x96xf32>
    %84 = arith.negf %83 : vector<1x96xf32>
    %85 = math.exp %84 : vector<1x96xf32>
    %cst_24 = arith.constant 1.000000e+00 : f32
    %86 = vector.broadcast %cst_24 : f32 to vector<1x96xf32>
    %87 = arith.addf %86, %85 : vector<1x96xf32>
    %88 = arith.divf %86, %87 : vector<1x96xf32>
    %89 = vector.extract_strided_slice %82 {offsets = [0, 96], sizes = [1, 32], strides = [1, 1]} : vector<1x128xf32> to vector<1x32xf32>
    %90 = math.tanh %89 : vector<1x32xf32>
    %91 = vector.extract_strided_slice %88 {offsets = [0, 32], sizes = [1, 32], strides = [1, 1]} : vector<1x96xf32> to vector<1x32xf32>
    %92 = arith.mulf %91, %77 : vector<1x32xf32>
    %93 = vector.extract_strided_slice %88 {offsets = [0, 0], sizes = [1, 32], strides = [1, 1]} : vector<1x96xf32> to vector<1x32xf32>
    %94 = arith.mulf %93, %90 : vector<1x32xf32>
    %95 = arith.addf %92, %94 : vector<1x32xf32>
    %96 = vector.extract_strided_slice %88 {offsets = [0, 64], sizes = [1, 32], strides = [1, 1]} : vector<1x96xf32> to vector<1x32xf32>
    %97 = math.tanh %95 : vector<1x32xf32>
    %98 = arith.mulf %96, %97 : vector<1x32xf32>
    %cst_25 = arith.constant dense<0.000000e+00> : vector<1x128xf32>
    %99 = tpu.matmul %98, %22, %cst_25 {dimension_numbers = #tpu.dot_dimension_numbers<[1], [0], [0], [1], [0, 0, 1, 1], [], []>} : vector<1x32xf32>, vector<32x128xf32>, vector<1x128xf32> -> vector<1x128xf32>
    %100 = arith.addf %99, %18 : vector<1x128xf32>
    %101 = vector.extract_strided_slice %100 {offsets = [0, 0], sizes = [1, 96], strides = [1, 1]} : vector<1x128xf32> to vector<1x96xf32>
    %102 = arith.negf %101 : vector<1x96xf32>
    %103 = math.exp %102 : vector<1x96xf32>
    %cst_26 = arith.constant 1.000000e+00 : f32
    %104 = vector.broadcast %cst_26 : f32 to vector<1x96xf32>
    %105 = arith.addf %104, %103 : vector<1x96xf32>
    %106 = arith.divf %104, %105 : vector<1x96xf32>
    %107 = vector.extract_strided_slice %100 {offsets = [0, 96], sizes = [1, 32], strides = [1, 1]} : vector<1x128xf32> to vector<1x32xf32>
    %108 = math.tanh %107 : vector<1x32xf32>
    %109 = vector.extract_strided_slice %106 {offsets = [0, 32], sizes = [1, 32], strides = [1, 1]} : vector<1x96xf32> to vector<1x32xf32>
    %110 = arith.mulf %109, %95 : vector<1x32xf32>
    %111 = vector.extract_strided_slice %106 {offsets = [0, 0], sizes = [1, 32], strides = [1, 1]} : vector<1x96xf32> to vector<1x32xf32>
    %112 = arith.mulf %111, %108 : vector<1x32xf32>
    %113 = arith.addf %110, %112 : vector<1x32xf32>
    %114 = vector.extract_strided_slice %106 {offsets = [0, 64], sizes = [1, 32], strides = [1, 1]} : vector<1x96xf32> to vector<1x32xf32>
    %115 = math.tanh %113 : vector<1x32xf32>
    %116 = arith.mulf %114, %115 : vector<1x32xf32>
    %cst_27 = arith.constant dense<0.000000e+00> : vector<1x128xf32>
    %117 = tpu.matmul %116, %22, %cst_27 {dimension_numbers = #tpu.dot_dimension_numbers<[1], [0], [0], [1], [0, 0, 1, 1], [], []>} : vector<1x32xf32>, vector<32x128xf32>, vector<1x128xf32> -> vector<1x128xf32>
    %118 = arith.addf %117, %19 : vector<1x128xf32>
    %119 = vector.extract_strided_slice %118 {offsets = [0, 0], sizes = [1, 96], strides = [1, 1]} : vector<1x128xf32> to vector<1x96xf32>
    %120 = arith.negf %119 : vector<1x96xf32>
    %121 = math.exp %120 : vector<1x96xf32>
    %cst_28 = arith.constant 1.000000e+00 : f32
    %122 = vector.broadcast %cst_28 : f32 to vector<1x96xf32>
    %123 = arith.addf %122, %121 : vector<1x96xf32>
    %124 = arith.divf %122, %123 : vector<1x96xf32>
    %125 = vector.extract_strided_slice %118 {offsets = [0, 96], sizes = [1, 32], strides = [1, 1]} : vector<1x128xf32> to vector<1x32xf32>
    %126 = math.tanh %125 : vector<1x32xf32>
    %127 = vector.extract_strided_slice %124 {offsets = [0, 32], sizes = [1, 32], strides = [1, 1]} : vector<1x96xf32> to vector<1x32xf32>
    %128 = arith.mulf %127, %113 : vector<1x32xf32>
    %129 = vector.extract_strided_slice %124 {offsets = [0, 0], sizes = [1, 32], strides = [1, 1]} : vector<1x96xf32> to vector<1x32xf32>
    %130 = arith.mulf %129, %126 : vector<1x32xf32>
    %131 = arith.addf %128, %130 : vector<1x32xf32>
    %132 = vector.extract_strided_slice %124 {offsets = [0, 64], sizes = [1, 32], strides = [1, 1]} : vector<1x96xf32> to vector<1x32xf32>
    %133 = math.tanh %131 : vector<1x32xf32>
    %134 = arith.mulf %132, %133 : vector<1x32xf32>
    %cst_29 = arith.constant dense<0.000000e+00> : vector<1x128xf32>
    %135 = tpu.matmul %134, %22, %cst_29 {dimension_numbers = #tpu.dot_dimension_numbers<[1], [0], [0], [1], [0, 0, 1, 1], [], []>} : vector<1x32xf32>, vector<32x128xf32>, vector<1x128xf32> -> vector<1x128xf32>
    %136 = arith.addf %135, %20 : vector<1x128xf32>
    %137 = vector.extract_strided_slice %136 {offsets = [0, 0], sizes = [1, 96], strides = [1, 1]} : vector<1x128xf32> to vector<1x96xf32>
    %138 = arith.negf %137 : vector<1x96xf32>
    %139 = math.exp %138 : vector<1x96xf32>
    %cst_30 = arith.constant 1.000000e+00 : f32
    %140 = vector.broadcast %cst_30 : f32 to vector<1x96xf32>
    %141 = arith.addf %140, %139 : vector<1x96xf32>
    %142 = arith.divf %140, %141 : vector<1x96xf32>
    %143 = vector.extract_strided_slice %136 {offsets = [0, 96], sizes = [1, 32], strides = [1, 1]} : vector<1x128xf32> to vector<1x32xf32>
    %144 = math.tanh %143 : vector<1x32xf32>
    %145 = vector.extract_strided_slice %142 {offsets = [0, 32], sizes = [1, 32], strides = [1, 1]} : vector<1x96xf32> to vector<1x32xf32>
    %146 = arith.mulf %145, %131 : vector<1x32xf32>
    %147 = vector.extract_strided_slice %142 {offsets = [0, 0], sizes = [1, 32], strides = [1, 1]} : vector<1x96xf32> to vector<1x32xf32>
    %148 = arith.mulf %147, %144 : vector<1x32xf32>
    %149 = arith.addf %146, %148 : vector<1x32xf32>
    %150 = vector.extract_strided_slice %142 {offsets = [0, 64], sizes = [1, 32], strides = [1, 1]} : vector<1x96xf32> to vector<1x32xf32>
    %151 = math.tanh %149 : vector<1x32xf32>
    %152 = arith.mulf %150, %151 : vector<1x32xf32>
    %cst_31 = arith.constant dense<0.000000e+00> : vector<1x128xf32>
    %153 = tpu.matmul %152, %22, %cst_31 {dimension_numbers = #tpu.dot_dimension_numbers<[1], [0], [0], [1], [0, 0, 1, 1], [], []>} : vector<1x32xf32>, vector<32x128xf32>, vector<1x128xf32> -> vector<1x128xf32>
    %154 = arith.addf %153, %21 : vector<1x128xf32>
    %155 = vector.extract_strided_slice %154 {offsets = [0, 0], sizes = [1, 96], strides = [1, 1]} : vector<1x128xf32> to vector<1x96xf32>
    %156 = arith.negf %155 : vector<1x96xf32>
    %157 = math.exp %156 : vector<1x96xf32>
    %cst_32 = arith.constant 1.000000e+00 : f32
    %158 = vector.broadcast %cst_32 : f32 to vector<1x96xf32>
    %159 = arith.addf %158, %157 : vector<1x96xf32>
    %160 = arith.divf %158, %159 : vector<1x96xf32>
    %161 = vector.extract_strided_slice %154 {offsets = [0, 96], sizes = [1, 32], strides = [1, 1]} : vector<1x128xf32> to vector<1x32xf32>
    %162 = math.tanh %161 : vector<1x32xf32>
    %163 = vector.extract_strided_slice %160 {offsets = [0, 32], sizes = [1, 32], strides = [1, 1]} : vector<1x96xf32> to vector<1x32xf32>
    %164 = arith.mulf %163, %149 : vector<1x32xf32>
    %165 = vector.extract_strided_slice %160 {offsets = [0, 0], sizes = [1, 32], strides = [1, 1]} : vector<1x96xf32> to vector<1x32xf32>
    %166 = arith.mulf %165, %162 : vector<1x32xf32>
    %167 = arith.addf %164, %166 : vector<1x32xf32>
    %168 = vector.extract_strided_slice %160 {offsets = [0, 64], sizes = [1, 32], strides = [1, 1]} : vector<1x96xf32> to vector<1x32xf32>
    %169 = math.tanh %167 : vector<1x32xf32>
    %170 = arith.mulf %168, %169 : vector<1x32xf32>
    %171 = vector.shape_cast %170 : vector<1x32xf32> to vector<1x1x32xf32>
    %c0_33 = arith.constant 0 : index
    %c0_34 = arith.constant 0 : index
    %c0_35 = arith.constant 0 : index
    %172 = vector.load %arg17[%c0_33, %c0_34, %c0_35] : memref<1x1x32xf32, #tpu.memory_space<vmem>>, vector<1x1x32xf32>
    tpu.vector_store %arg17[%c0_33, %c0_34, %c0_35], %171 {strides = array<i32>} : memref<1x1x32xf32, #tpu.memory_space<vmem>>, vector<1x1x32xf32>,
    %173 = vector.shape_cast %167 : vector<1x32xf32> to vector<1x1x32xf32>
    %c0_36 = arith.constant 0 : index
    %c0_37 = arith.constant 0 : index
    %c0_38 = arith.constant 0 : index
    %174 = vector.load %arg18[%c0_36, %c0_37, %c0_38] : memref<1x1x32xf32, #tpu.memory_space<vmem>>, vector<1x1x32xf32>
    tpu.vector_store %arg18[%c0_36, %c0_37, %c0_38], %173 {strides = array<i32>} : memref<1x1x32xf32, #tpu.memory_space<vmem>>, vector<1x1x32xf32>,
    %175 = tpu.concatenate %44, %62, %80, %98, %116, %134, %152, %170 in 0 : vector<1x32xf32>, vector<1x32xf32>, vector<1x32xf32>, vector<1x32xf32>, vector<1x32xf32>, vector<1x32xf32>, vector<1x32xf32>, vector<1x32xf32> -> vector<8x32xf32>
    %c0_39 = arith.constant 0 : index
    %c0_40 = arith.constant 0 : index
    %c0_41 = arith.constant 0 : index
    %176 = vector.load %arg8[%c0_39, %c0_40, %c0_41] : memref<1x10x32xf32, #tpu.memory_space<vmem>>, vector<1x10x32xf32>
    %177 = vector.shape_cast %176 : vector<1x10x32xf32> to vector<10x32xf32>
    %c0_42 = arith.constant 0 : index
    %c0_43 = arith.constant 0 : index
    %178 = vector.load %arg9[%c0_42, %c0_43] : memref<32x32xf32, #tpu.memory_space<vmem>>, vector<32x32xf32>
    %cst_44 = arith.constant dense<0.000000e+00> : vector<10x32xf32>
    %179 = tpu.matmul %177, %178, %cst_44 {dimension_numbers = #tpu.dot_dimension_numbers<[1], [0], [0], [1], [0, 0, 1, 1], [], []>} : vector<10x32xf32>, vector<32x32xf32>, vector<10x32xf32> -> vector<10x32xf32>
    %c0_45 = arith.constant 0 : index
    %c0_46 = arith.constant 0 : index
    %180 = vector.load %arg10[%c0_45, %c0_46] : memref<1x32xf32, #tpu.memory_space<vmem>>, vector<1x32xf32>
    %181 = vector.broadcast %180 : vector<1x32xf32> to vector<10x32xf32>
    %182 = arith.addf %179, %181 : vector<10x32xf32>
    %cst_47 = arith.constant dense<0.000000e+00> : vector<8x10xf32>
    %183 = tpu.matmul %175, %182, %cst_47 {dimension_numbers = #tpu.dot_dimension_numbers<[1], [1], [0], [0], [0, 0, 1, 0], [], []>} : vector<8x32xf32>, vector<10x32xf32>, vector<8x10xf32> -> vector<8x10xf32>
    %cst_48 = arith.constant dense<0xFF800000> : vector<8xf32>
    %184 = vector.multi_reduction <maximumf>, %183, %cst_48 [1] : vector<8x10xf32> to vector<8xf32>
    %185 = vector.shape_cast %184 : vector<8xf32> to vector<8x1xf32>
    %186 = vector.broadcast %185 : vector<8x1xf32> to vector<8x10xf32>
    %187 = arith.subf %183, %186 : vector<8x10xf32>
    %188 = math.exp %187 : vector<8x10xf32>
    %cst_49 = arith.constant dense<0.000000e+00> : vector<8xf32>
    %189 = vector.multi_reduction <add>, %188, %cst_49 [1] : vector<8x10xf32> to vector<8xf32>
    %190 = vector.shape_cast %189 : vector<8xf32> to vector<8x1xf32>
    %191 = tpu.reciprocal %190 : vector<8x1xf32> -> vector<8x1xf32>
    %192 = vector.broadcast %191 : vector<8x1xf32> to vector<8x10xf32>
    %193 = arith.mulf %188, %192 : vector<8x10xf32>
    %cst_50 = arith.constant dense<0.000000e+00> : vector<8x32xf32>
    %194 = tpu.matmul %193, %177, %cst_50 {dimension_numbers = #tpu.dot_dimension_numbers<[1], [0], [0], [1], [0, 0, 1, 1], [], []>} : vector<8x10xf32>, vector<10x32xf32>, vector<8x32xf32> -> vector<8x32xf32>
    %c0_51 = arith.constant 0 : index
    %c0_52 = arith.constant 0 : index
    %195 = vector.load %arg11[%c0_51, %c0_52] : memref<32x32xf32, #tpu.memory_space<vmem>>, vector<32x32xf32>
    %cst_53 = arith.constant dense<0.000000e+00> : vector<8x32xf32>
    %196 = tpu.matmul %194, %195, %cst_53 {dimension_numbers = #tpu.dot_dimension_numbers<[1], [0], [0], [1], [0, 0, 1, 1], [], []>} : vector<8x32xf32>, vector<32x32xf32>, vector<8x32xf32> -> vector<8x32xf32>
    %c0_54 = arith.constant 0 : index
    %c0_55 = arith.constant 0 : index
    %197 = vector.load %arg12[%c0_54, %c0_55] : memref<32x32xf32, #tpu.memory_space<vmem>>, vector<32x32xf32>
    %cst_56 = arith.constant dense<0.000000e+00> : vector<8x32xf32>
    %198 = tpu.matmul %175, %197, %cst_56 {dimension_numbers = #tpu.dot_dimension_numbers<[1], [0], [0], [1], [0, 0, 1, 1], [], []>} : vector<8x32xf32>, vector<32x32xf32>, vector<8x32xf32> -> vector<8x32xf32>
    %199 = arith.addf %196, %198 : vector<8x32xf32>
    %c0_57 = arith.constant 0 : index
    %c0_58 = arith.constant 0 : index
    %200 = vector.load %arg13[%c0_57, %c0_58] : memref<1x32xf32, #tpu.memory_space<vmem>>, vector<1x32xf32>
    %201 = vector.broadcast %200 : vector<1x32xf32> to vector<8x32xf32>
    %202 = arith.addf %199, %201 : vector<8x32xf32>
    %203 = math.tanh %202 : vector<8x32xf32>
    %c0_59 = arith.constant 0 : index
    %c0_60 = arith.constant 0 : index
    %204 = vector.load %arg14[%c0_59, %c0_60] : memref<32x64xf32, #tpu.memory_space<vmem>>, vector<32x64xf32>
    %cst_61 = arith.constant dense<0.000000e+00> : vector<8x64xf32>
    %205 = tpu.matmul %203, %204, %cst_61 {dimension_numbers = #tpu.dot_dimension_numbers<[1], [0], [0], [1], [0, 0, 1, 1], [], []>} : vector<8x32xf32>, vector<32x64xf32>, vector<8x64xf32> -> vector<8x64xf32>
    %c0_62 = arith.constant 0 : index
    %c0_63 = arith.constant 0 : index
    %206 = vector.load %arg15[%c0_62, %c0_63] : memref<1x64xf32, #tpu.memory_space<vmem>>, vector<1x64xf32>
    %207 = vector.broadcast %206 : vector<1x64xf32> to vector<8x64xf32>
    %208 = arith.addf %205, %207 : vector<8x64xf32>
    %209 = vector.shape_cast %208 : vector<8x64xf32> to vector<1x8x64xf32>
    %c0_64 = arith.constant 0 : index
    %c0_65 = arith.constant 0 : index
    %c0_66 = arith.constant 0 : index
    %210 = vector.load %arg16[%c0_64, %c0_65, %c0_66] : memref<1x8x64xf32, #tpu.memory_space<vmem>>, vector<1x8x64xf32>
    tpu.vector_store %arg16[%c0_64, %c0_65, %c0_66], %209 {strides = array<i32>} : memref<1x8x64xf32, #tpu.memory_space<vmem>>, vector<1x8x64xf32>,
    return
  }
  func.func @transform_0(%arg0: i32) -> (i32, i32, i32) {
    %c0_i32 = arith.constant 0 : i32
    %c0_i32_0 = arith.constant 0 : i32
    %c0_i32_1 = arith.constant 0 : i32
    return %arg0, %c0_i32, %c0_i32_0 : i32, i32, i32
  }
  func.func @transform_1(%arg0: i32) -> (i32, i32) {
    %c0_i32 = arith.constant 0 : i32
    %c0_i32_0 = arith.constant 0 : i32
    %c0_i32_1 = arith.constant 0 : i32
    return %c0_i32, %c0_i32_0 : i32, i32
  }
  func.func @transform_2(%arg0: i32) -> (i32, i32, i32) {
    %c0_i32 = arith.constant 0 : i32
    %c0_i32_0 = arith.constant 0 : i32
    %c0_i32_1 = arith.constant 0 : i32
    return %arg0, %c0_i32, %c0_i32_0 : i32, i32, i32
  }
  func.func @transform_3(%arg0: i32) -> (i32, i32, i32) {
    %c0_i32 = arith.constant 0 : i32
    %c0_i32_0 = arith.constant 0 : i32
    %c0_i32_1 = arith.constant 0 : i32
    return %arg0, %c0_i32, %c0_i32_0 : i32, i32, i32
  }
  func.func @transform_4(%arg0: i32) -> (i32, i32) {
    %c0_i32 = arith.constant 0 : i32
    %c0_i32_0 = arith.constant 0 : i32
    %c0_i32_1 = arith.constant 0 : i32
    return %c0_i32, %c0_i32_0 : i32, i32
  }
  func.func @transform_5(%arg0: i32) -> (i32, i32) {
    %c0_i32 = arith.constant 0 : i32
    %c0_i32_0 = arith.constant 0 : i32
    %c0_i32_1 = arith.constant 0 : i32
    return %c0_i32, %c0_i32_0 : i32, i32
  }
  func.func @transform_6(%arg0: i32) -> (i32, i32) {
    %c0_i32 = arith.constant 0 : i32
    %c0_i32_0 = arith.constant 0 : i32
    %c0_i32_1 = arith.constant 0 : i32
    return %c0_i32, %c0_i32_0 : i32, i32
  }
  func.func @transform_7(%arg0: i32) -> (i32, i32, i32) {
    %c0_i32 = arith.constant 0 : i32
    %c0_i32_0 = arith.constant 0 : i32
    %c0_i32_1 = arith.constant 0 : i32
    return %arg0, %c0_i32, %c0_i32_0 : i32, i32, i32
  }
  func.func @transform_8(%arg0: i32) -> (i32, i32) {
    %c0_i32 = arith.constant 0 : i32
    %c0_i32_0 = arith.constant 0 : i32
    %c0_i32_1 = arith.constant 0 : i32
    return %c0_i32, %c0_i32_0 : i32, i32
  }
  func.func @transform_9(%arg0: i32) -> (i32, i32) {
    %c0_i32 = arith.constant 0 : i32
    %c0_i32_0 = arith.constant 0 : i32
    %c0_i32_1 = arith.constant 0 : i32
    return %c0_i32, %c0_i32_0 : i32, i32
  }
  func.func @transform_10(%arg0: i32) -> (i32, i32) {
    %c0_i32 = arith.constant 0 : i32
    %c0_i32_0 = arith.constant 0 : i32
    %c0_i32_1 = arith.constant 0 : i32
    return %c0_i32, %c0_i32_0 : i32, i32
  }
  func.func @transform_11(%arg0: i32) -> (i32, i32) {
    %c0_i32 = arith.constant 0 : i32
    %c0_i32_0 = arith.constant 0 : i32
    %c0_i32_1 = arith.constant 0 : i32
    return %c0_i32, %c0_i32_0 : i32, i32
  }
  func.func @transform_12(%arg0: i32) -> (i32, i32) {
    %c0_i32 = arith.constant 0 : i32
    %c0_i32_0 = arith.constant 0 : i32
    %c0_i32_1 = arith.constant 0 : i32
    return %c0_i32, %c0_i32_0 : i32, i32
  }
  func.func @transform_13(%arg0: i32) -> (i32, i32) {
    %c0_i32 = arith.constant 0 : i32
    %c0_i32_0 = arith.constant 0 : i32
    %c0_i32_1 = arith.constant 0 : i32
    return %c0_i32, %c0_i32_0 : i32, i32
  }
  func.func @transform_14(%arg0: i32) -> (i32, i32) {
    %c0_i32 = arith.constant 0 : i32
    %c0_i32_0 = arith.constant 0 : i32
    %c0_i32_1 = arith.constant 0 : i32
    return %c0_i32, %c0_i32_0 : i32, i32
  }
  func.func @transform_15(%arg0: i32) -> (i32, i32, i32) {
    %c0_i32 = arith.constant 0 : i32
    %c0_i32_0 = arith.constant 0 : i32
    %c0_i32_1 = arith.constant 0 : i32
    return %arg0, %c0_i32, %c0_i32_0 : i32, i32, i32
  }
  func.func @transform_16(%arg0: i32) -> (i32, i32, i32) {
    %c0_i32 = arith.constant 0 : i32
    %c0_i32_0 = arith.constant 0 : i32
    %c0_i32_1 = arith.constant 0 : i32
    return %arg0, %c0_i32, %c0_i32_0 : i32, i32, i32
  }
  func.func @transform_17(%arg0: i32) -> (i32, i32, i32) {
    %c0_i32 = arith.constant 0 : i32
    %c0_i32_0 = arith.constant 0 : i32
    %c0_i32_1 = arith.constant 0 : i32
    return %arg0, %c0_i32, %c0_i32_0 : i32, i32, i32
  }
}

</mosaic_0001>

<bundles_post_ra>
// kernel: decoder_forward.1
= control target key start
LH: loop header
LB: loop body
LE: loop exit
PB: predicated region body
PF: predicated region fallthrough
CT: control target
= control target key end

     0   :  { %s3464_s0 = inlined_call_operand.vmem [shape: s32[2,8,1], index: 0, kind: input, shape index: {}]   ;;  %s3465_s1 = inlined_call_operand.vmem [shape: f32[64,16], index: 1, kind: input, shape index: {}]   ;;  %s3466_s2 = inlined_call_operand.vmem [shape: f32[2,1,32], index: 2, kind: input, shape index: {}]   ;;  %s3467_s3 = inlined_call_operand.vmem [shape: f32[2,1,32], index: 3, kind: input, shape index: {}]   ;;  %s3468_s4 = inlined_call_operand.vmem [shape: f32[16,128], index: 4, kind: input, shape index: {}]   ;;  %s3469_s5 = inlined_call_operand.vmem [shape: f32[32,128], index: 5, kind: input, shape index: {}]   ;;  %s3470_s6 = inlined_call_operand.vmem [shape: f32[1,128], index: 6, kind: input, shape index: {}]   ;;  %s3471_s7 = inlined_call_operand.vmem [shape: f32[2,10,32], index: 7, kind: input, shape index: {}]   ;;  %s3472_s8 = inlined_call_operand.vmem [shape: f32[32,32], index: 8, kind: input, shape index: {}]   ;;  %s3473_s9 = inlined_call_operand.vmem [shape: f32[1,32], index: 9, kind: input, shape index: {}]   ;;  %s3474_s10 = inlined_call_operand.vmem [shape: f32[32,32], index: 10, kind: input, shape index: {}]   ;;  %s3475_s11 = inlined_call_operand.vmem [shape: f32[32,32], index: 11, kind: input, shape index: {}]   ;;  %s3476_s12 = inlined_call_operand.vmem [shape: f32[1,32], index: 12, kind: input, shape index: {}]   ;;  %s3477_s13 = inlined_call_operand.vmem [shape: f32[32,64], index: 13, kind: input, shape index: {}]   ;;  %s3478_s14 = inlined_call_operand.vmem [shape: f32[1,64], index: 14, kind: input, shape index: {}]   ;;  %s3479_s15 = inlined_call_operand.vmem [shape: f32[2,8,64], index: 15, kind: output, shape index: {0}]   ;;  %s3480_s16 = inlined_call_operand.hbm [shape: f32[2,1,32], index: 16, kind: output, shape index: {1}]   ;;  %s3481_s17 = inlined_call_operand.hbm [shape: f32[2,1,32], index: 17, kind: output, shape index: {2}]  }
   0x1   :  { %3494 = sst [smem:[#allocation14_spill]] %s3464_s0 }
   0x2   :  { %3495 = sst [smem:[#allocation15_spill]] %s3465_s1 }
   0x3   :  { %3496 = sst [smem:[#allocation16_spill]] %s3466_s2 }
   0x4   :  { %3497 = sst [smem:[#allocation17_spill]] %s3467_s3 }
   0x5   :  { %3498 = sst [smem:[#allocation18_spill]] %s3468_s4 }
   0x6   :  { %3499 = sst [smem:[#allocation19_spill]] %s3469_s5 }
   0x7   :  { %3500 = sst [smem:[#allocation20_spill]] %s3479_s15 }
   0x8   :  { %23 = vsyncpa [#allocation3], 0 }
   0x9   :  { %25 = vsyncpa [#allocation3 + $0x1], 0 }
   0xa   :  { %26 = vsyncpa [#allocation5], 0 }
   0xb   :  { %28 = vsyncpa [#allocation5 + $0x1], 0  ;;  %s3039_s24 = smov 0   ;;  %s3041_s25 = smov 0  }
   0xc   :  { %s3043_s26 = smov 0   ;;  %s3045_s27 = smov 0  }
   0xd LB: > { %3501 = sst [smem:[#allocation8_spill]] %s2925_s24  ;;  %s3060_s28 = sadd.s32 4294967295, %s2937_s27   ;;  %s2937_s27 = sphi %s3045_s27, %s3523_s27   ;;  %s2933_s26 = sphi %s3043_s26, %s3525_s26   ;;  %s2929_s25 = sphi %s3041_s25, %s3527_s25   ;;  %s2925_s24 = sphi %s3039_s24, %s3526_s24  }
   0xe   : > { %3502 = sst [smem:[#allocation9_spill]] %s2933_s26  ;;  %s2325_s29 = sadd.s32 4294967294, %s2937_s27  }
   0xf   : > { %3503 = sst [smem:[#allocation10_spill]] %s2937_s27  ;;  %s3064_s0 = sadd.s32 1, %s2937_s27  }
  0x10   : > { %3504 = sst [smem:[#allocation11_spill]] %s3064_s0  ;;  %s402_s30 = sadd.s32 1, %s2933_s26 }
  0x11   : > { %s399_s18 = ssub.s32 %s2937_s27, %s3064_s0  ;;  %p412_p0 = scmp.ne.s32.totalorder %s2933_s26, %s2929_s25 }
  0x12   : > { %p400_p1 = scmp.eq.s32.totalorder %s399_s18, 0  ;;  %p413_p2 = scmp.eq.s32.totalorder %s3060_s28, 1 }
  0x13   : > { %p418_p3 = scmp.ne.s32.totalorder %s2929_s25, %s2925_s24  ;;  %p419_p4 = scmp.eq.s32.totalorder %s2325_s29, 1 }
  0x14   : > { %s3075_s19 = scalar_select %p400_p1, %s2933_s26, %s402_s30  }
  0x15   : > { %p3077_p5 = por %p413_p2, %p412_p0  ;;  %p3081_p6 = por %p419_p4, %p418_p3 }
  0x16   : > { %3505 = sst [smem:[#allocation12_spill]] %s3075_s19  ;;  %p2328_p7 = scmp.ge.s32.totalorder %s2937_s27, 1 }
  0x17   : > { %s3507_s20 = scalar_select %p3081_p6, 1, 0 }
  0x18   : > { %p523_p8 = scmp.lt.s32.totalorder %s2937_s27, 3 }
  0x19   : > { %3508 = sst [smem:[#allocation13_spill]] %s3507_s20 }
  0x1a   : > { %p524_p9 = pnand %p2328_p7, %p523_p8 }
  0x1b   : > { %p592_p10 = scmp.lt.s32.totalorder (!%p524_p9), %s3060_s28, 1  ;;  %s3509_s23 = sld [smem:[#allocation15_spill]] (!%p524_p9)  ;;  %v2939_v3 = vmov (!%p524_p9), 0   ;;  %v2940_v4 = vmov (!%p524_p9), 0.0|0.0   ;;  %vm2941_vm0 = vmmov (!%p524_p9), 0   ;;  %v2942_v14 = vmov (!%p524_p9), 0.0  }
  0x1c   : > { %527 = sbr.rel (%p524_p9) target bundleno = 7189 (0x1c15), region = 80  ;;  %2772 = vset.pattern.permute.xlu0 (!%p524_p9), %v2939_v3  ;;  %2623 = vmatprep.subr.bf16.mxu0 (!%p524_p9), %v2940_v4  ;;  %s3510_s20 = sld [smem:[#allocation14_spill]] (!%p524_p9)  ;;  %v612_v19 = vlaneseq (!%p524_p9)  ;;  %vm628_vm1 = vcmask (!%p524_p9), 523264   ;;  %vm711_vm3 = vcmask (!%p524_p9), 130048   ;;  %vm791_vm4 = vcmask (!%p524_p9), 261120  }
  0x1d   : > { %2635 = vmatprep.subr.bf16.mxu1 (!%p524_p9), %v2940_v4  ;;  %2467 = vmatprep.mubr.msk.f32.mxu0 (!%p524_p9), %vm2941_vm0, %v2942_v14  ;;  %s3511_s4 = sld [smem:[#allocation18_spill]] (!%p524_p9)  ;;  %s3512_s5 = sld [smem:[#allocation19_spill]] (!%p524_p9)  ;;  %v2335_v35 = vld [vmem:[%s3470_s6] ss:$0 sm:$0xff] (!%p524_p9)  ;;  %vm1630_vm5 = vcmask (!%p524_p9), 1040384   ;;  %vm1632_vm6 = vcmask (!%p524_p9), 1041408   ;;  %vm2696_vm11 = vmpackc.low (!%p524_p9), %vm791_vm4, %vm791_vm4 }
  0x1e   : > { %2474 = vmatprep.mubr.msk.f32.mxu1 (!%p524_p9), %vm2941_vm0, %v2942_v14  ;;  %v613_v20 = vand.u32 (!%p524_p9), 127, %v612_v19  ;;  %s3513_s3 = sld [smem:[#allocation17_spill]] (!%p524_p9)  ;;  %s2943_s27 = smov (!%p524_p9), 32   ;;  %vm1634_vm7 = vcmask (!%p524_p9), 1042432   ;;  %vm1636_vm8 = vcmask (!%p524_p9), 1043456   ;;  %vm1638_vm9 = vcmask (!%p524_p9), 1044480  }
  0x1f   : > { %s3514_s2 = sld [smem:[#allocation16_spill]] (!%p524_p9)  ;;  %vm1640_vm10 = vcmask (!%p524_p9), 1045504   ;;  %vm1642_vm12 = vcmask (!%p524_p9), 1046528   ;;  %vm1819_vm13 = vcmask (!%p524_p9), 80896   ;;  %vm1609_vm14 = vcmask (!%p524_p9), 253952   ;;  %s3493_s29 = sshll.u32 (!%p524_p9), %s3060_s28, 4 }
  0x20   : > { %vm2946_vm15 = vmmov (!%p524_p9), 1  }
  0x21   : > { %v620_v0 = vld [vmem:[%s3509_s23] sm:$0xff] (!%p524_p9)  ;;  %v621_v1 = vld [vmem:[%s3509_s23 + $0x8] sm:$0xff] (!%p524_p9)  ;;  %v622_v2 = vld [vmem:[%s3509_s23 + $0x10] sm:$0xff] (!%p524_p9) }
  0x22   : > { %v2624_v5 = vpack.c.bf16 (!%p524_p9), %v621_v1, %v620_v0  ;;  %v623_v6 = vld [vmem:[%s3509_s23 + $0x18] sm:$0xff] (!%p524_p9)  ;;  %v624_v8 = vld [vmem:[%s3509_s23 + $0x20] sm:$0xff] (!%p524_p9)  ;;  %v625_v9 = vld [vmem:[%s3509_s23 + $0x28] sm:$0xff] (!%p524_p9) }
  0x23   : > { %s3102_s21 = scalar_select %p592_p10, %s3060_s28, 1  ;;  %v2627_v7 = vpack.c.bf16 %v623_v6, %v622_v2  ;;  %v2630_v11 = vpack.c.bf16 %v625_v9, %v624_v8  ;;  %v626_v12 = vld [vmem:[%s3509_s23 + $0x30] sm:$0xff]  ;;  %v627_v13 = vld [vmem:[%s3509_s23 + $0x38] sm:$0xff]  ;;  %v702_v15 = vld [vmem:[%s3511_s4] sm:$0xff] }
  0x24   : > { %2625 = vmatpush3.bf16.msra.mxu0 %v2624_v5  ;;  %v703_v16 = vld [vmem:[%s3511_s4 + $0x8] sm:$0xff]  ;;  %v2633_v18 = vpack.c.bf16 %v627_v13, %v626_v12  ;;  %v785_v23 = vld [vmem:[%s3512_s5] sm:$0xff]  ;;  %v787_v26 = vld [vmem:[%s3512_s5 + $0x10] sm:$0xff] }
  0x25   : > { %s3489_s19 = sshll.u32 %s3102_s21, 3  ;;  %2626 = vmatprep.subr.bf16.mxu0 %v2940_v4  ;;  %v2636_v17 = vpack.c.bf16 %v703_v16, %v702_v15  ;;  %v786_v24 = vld [vmem:[%s3512_s5 + $0x8] sm:$0xff]  ;;  %v788_v27 = vld [vmem:[%s3512_s5 + $0x18] sm:$0xff]  ;;  %s601_s15 = scalar_lea.vmem %s3513_s3, %s3102_s21 }
  0x26   : > { %s595_s24 = scalar_lea.vmem %s3510_s20, %s3489_s19  ;;  %v3148_v25 = vpack.c.bf16 %v786_v24, %v785_v23  ;;  %v3158_v28 = vpack.c.bf16 %v788_v27, %v787_v26  ;;  %v2339_v29 = vld [vmem:[%s601_s15] ss:$0 sm:$0xff]  ;;  %s598_s22 = scalar_lea.vmem %s3514_s2, %s3102_s21 }
  0x27   : > { %v611_v10 = vld [vmem:[%s595_s24] sm:$0xff]  ;;  %2637 = vmatpush3.bf16.msra.mxu1 %v2636_v17  ;;  %877 = vrot.lane.b32.xlu1 %v2339_v29, %s2943_s27  ;;  %s3490_s24 = smov 64   ;;  %s2371_s19 = sshll.u32 %s3102_s21, 4 }
  0x28   : > { %615 = vperm.xlu0 %2772, %v611_v10   ;;  %2628 = vmatpush3.bf16.msra.mxu0 %v2627_v7  ;;  %v789_v32 = vld [vmem:[%s598_s22] sm:$0x1]  ;;  %s606_s18 = scalar_lea.vmem %s3471_s7, %s2371_s19  ;;  %s3333_s19 = sand.u32 1, %s2929_s25  }
  0x29   : > { %2629 = vmatprep.subr.bf16.mxu0 %v2940_v4  ;;  %2638 = vmatprep.subr.bf16.mxu1 %v2940_v4  ;;  %s2945_s15 = smov 96   ;;  %s3492_s26 = scalar_lea.vmem [#allocation4], %s3333_s19 }
  0x2a   : > { %s2947_s22 = smov [#allocation2]  }
  0x2c   : > { %2631 = vmatpush3.bf16.msra.mxu0 %v2630_v11 }
  0x2d   : > { %2632 = vmatprep.subr.bf16.mxu0 %v2940_v4 }
  0x30   : > { %2634 = vmatpush3.bf16.msra.mxu0 %v2633_v18 }
  0x31   : > { %2650 = vmatprep.subr.bf16.mxu0 %v2940_v4 }
  0x99   : > { %v878_v47 = vpop.permute.xlu1 %877 }
  0xa7   : > { %v616_v21 = vpop.permute.xlu0 %615 }
  0xa8   : > { %vm617_vm2 = vcmp.eq.s32.totalorder %v613_v20, %v616_v21 }
  0xa9   : > { %v2333_v22 = vsel %vm617_vm2, 1.0, %v2942_v14  ;;  %vm2700_vm2 = vmpackc.low %vm1632_vm6, %vm2946_vm15 }
  0xaa   : > { %2468 = vmatmul.mubr.msk.f32.vlgmr.msra.gmra.mrb[0].mxu0 %vm628_vm1, %v2333_v22 }
  0xab   : > { %2507 = vmatprep.mubr.msk.f32.mxu0 %vm2941_vm0, %v2942_v14  ;;  %2652 = vmatpush3.bf16.msra.mxu0 %v3148_v25 }
  0xac   : > { %2653 = vmatprep.subr.bf16.mxu0 %v2940_v4 }
  0xaf   : > { %2655 = vmatpush3.bf16.msra.mxu0 %v3158_v28 }
  0xb0   : > { %2662 = vmatprep.subr.bf16.mxu0 %v2940_v4 }
 0x17d   : > { %v698_v30 = vpop.f32.mrb[0].mxu0 }
 0x17e   : > { %v2469_v31 = vpop.f32.mrb[1].mxu0  ;;  %2475 = vmatmul.mubr.msk.f32.vlgmr.msra.gmra.mrb[0].mxu1 %vm711_vm3, %v698_v30 }
 0x17f   : > { %2640 = vmatpush3.bf16.msra.mxu1 %v3148_v25  ;;  %2485 = vmatprep.mubr.msk.f32.mxu1 %vm2941_vm0, %v2942_v14 }
 0x180   : > { %2641 = vmatprep.subr.bf16.mxu1 %v2940_v4 }
 0x183   : > { %2643 = vmatpush3.bf16.msra.mxu1 %v3158_v28 }
 0x184   : > { %2644 = vmatprep.subr.bf16.mxu1 %v2940_v4 }
 0x186   : > { %2486 = vmatmul.mubr.msk.f32.vlgmr.msra.gmra.mrb[2].mxu1 %vm791_vm4, %v789_v32 }
 0x187   : > { %2646 = vmatpush3.bf16.msra.mxu1 %v3148_v25  ;;  %2496 = vmatprep.mubr.msk.f32.mxu1 %vm2941_vm0, %v2942_v14 }
 0x188   : > { %2647 = vmatprep.subr.bf16.mxu1 %v2940_v4 }
 0x18b   : > { %2649 = vmatpush3.bf16.msra.mxu1 %v3158_v28 }
 0x18c   : > { %2656 = vmatprep.subr.bf16.mxu1 %v2940_v4 }
 0x251   : > { %v781_v33 = vpop.f32.mrb[0].mxu1 }
 0x252   : > { %v2476_v34 = vpop.f32.mrb[1].mxu1  ;;  %v3187_v36 = vadd.f32 %v2335_v35, %v781_v33 }
 0x254   : > { %v901_v55 = vrot.slane %v3187_v36, 1  ;;  %v1002_v10 = vrot.slane %v3187_v36, 2  ;;  %v1103_v35 = vrot.slane %v3187_v36, 3 }
 0x259   : > { %v861_v37 = vpop.f32.mrb[2].mxu1 }
 0x25a   : > { %v862_v38 = vadd.f32 %v861_v37, %v3187_v36  ;;  %v2487_v39 = vpop.f32.mrb[3].mxu1 }
 0x25c   : > { %2773 = vtanh.f32 %v862_v38  ;;  %v2338_v41 = vmul.f32 -1.442695, %v862_v38 }
 0x25e   : > { %2775 = vpow2.f32 %v2338_v41 }
 0x266   : > { %v2774_v40 = vpop.eup %2773 }
 0x267   : > { %882 = vrot.lane.b32.xlu0 %v2774_v40, %s2943_s27 }
 0x268   : > { %v2776_v42 = vpop.eup %2775 }
 0x269   : > { %v868_v43 = vadd.f32 1.0, %v2776_v42 }
 0x26b   : > { %2777 = vrcp.f32 %v868_v43 }
 0x275   : > { %v2778_v44 = vpop.eup %2777 }
 0x276   : > { %v880_v48 = vmul.f32 %v2778_v44, %v878_v47 }
 0x2d9   : > { %v883_v45 = vpop.permute.xlu0 %882 }
 0x2da   : > { %v885_v46 = vmul.f32 %v2778_v44, %v883_v45 }
 0x2dc   : > { %887 = vrot.lane.b32.xlu1 %v885_v46, %s2943_s27 }
 0x34e   : > { %v888_v49 = vpop.permute.xlu1 %887 }
 0x34f   : > { %v890_v50 = vadd.f32 %v888_v49, %v880_v48 }
 0x351   : > { %2779 = vtanh.f32 %v890_v50 }
 0x35b   : > { %v2780_v51 = vpop.eup %2779 }
 0x35c   : > { %893 = vrot.lane.b32.xlu0 %v2780_v51, %s2943_s27 }
 0x3ce   : > { %v894_v52 = vpop.permute.xlu0 %893 }
 0x3cf   : > { %v3193_v53 = vmul.f32 %v2778_v44, %v894_v52 }
 0x3d1   : > { %898 = vrot.lane.b32.xlu1 %v3193_v53, %s3490_s24 }
 0x443   : > { %v899_v54 = vpop.permute.xlu1 %898 }
 0x444   : > { %2497 = vmatmul.mubr.msk.f32.vlgmr.msra.gmra.mrb[4].mxu1 %vm791_vm4, %v899_v54 }
 0x445   : > { %2658 = vmatpush3.bf16.msra.mxu1 %v3148_v25  ;;  %2518 = vmatprep.mubr.msk.f32.mxu1 %vm2941_vm0, %v2942_v14 }
 0x446   : > { %2659 = vmatprep.subr.bf16.mxu1 %v2940_v4 }
 0x449   : > { %2661 = vmatpush3.bf16.msra.mxu1 %v3158_v28 }
 0x44a   : > { %2668 = vmatprep.subr.bf16.mxu1 %v2940_v4 }
 0x517   : > { %v971_v56 = vpop.f32.mrb[4].mxu1 }
 0x518   : > { %v972_v57 = vadd.f32 %v971_v56, %v901_v55  ;;  %v2498_v58 = vpop.f32.mrb[5].mxu1  ;;  %v1204_v56 = vrot.slane %v3187_v36, 4 }
 0x51a   : > { %2781 = vtanh.f32 %v972_v57  ;;  %v2341_v60 = vmul.f32 -1.442695, %v972_v57 }
 0x51c   : > { %2783 = vpow2.f32 %v2341_v60 }
 0x524   : > { %v2782_v59 = vpop.eup %2781 }
 0x525   : > { %984 = vrot.lane.b32.xlu0 %v2782_v59, %s2943_s27 }
 0x526   : > { %v2784_v61 = vpop.eup %2783 }
 0x527   : > { %v978_v62 = vadd.f32 1.0, %v2784_v61 }
 0x529   : > { %2785 = vrcp.f32 %v978_v62 }
 0x533   : > { %v2786_v63 = vpop.eup %2785 }
 0x534   : > { %v982_v2 = vmul.f32 %v2786_v63, %v890_v50 }
 0x597   : > { %v985_v0 = vpop.permute.xlu0 %984 }
 0x598   : > { %v987_v1 = vmul.f32 %v2786_v63, %v985_v0 }
 0x59a   : > { %989 = vrot.lane.b32.xlu1 %v987_v1, %s2943_s27 }
 0x60c   : > { %v990_v3 = vpop.permute.xlu1 %989 }
 0x60d   : > { %v992_v5 = vadd.f32 %v990_v3, %v982_v2 }
 0x60f   : > { %2787 = vtanh.f32 %v992_v5 }
 0x619   : > { %v2788_v6 = vpop.eup %2787 }
 0x61a   : > { %995 = vrot.lane.b32.xlu0 %v2788_v6, %s2943_s27 }
 0x68c   : > { %v996_v7 = vpop.permute.xlu0 %995 }
 0x68d   : > { %v998_v8 = vmul.f32 %v2786_v63, %v996_v7 }
 0x68f   : > { %1000 = vrot.lane.b32.xlu1 %v998_v8, %s3490_s24  ;;  %v1616_v27 = vrot.slane %v998_v8, 7 }
 0x691   : > { %v1631_v32 = vsel %vm1630_vm5, %v3193_v53, %v1616_v27 }
 0x701   : > { %v1001_v9 = vpop.permute.xlu1 %1000 }
 0x702   : > { %2508 = vmatmul.mubr.msk.f32.vlgmr.msra.gmra.mrb[2].mxu0 %vm791_vm4, %v1001_v9 }
 0x703   : > { %2664 = vmatpush3.bf16.msra.mxu0 %v3148_v25  ;;  %2529 = vmatprep.mubr.msk.f32.mxu0 %vm2941_vm0, %v2942_v14 }
 0x704   : > { %2665 = vmatprep.subr.bf16.mxu0 %v2940_v4 }
 0x707   : > { %2667 = vmatpush3.bf16.msra.mxu0 %v3158_v28 }
 0x708   : > { %2674 = vmatprep.subr.bf16.mxu0 %v2940_v4 }
 0x7d5   : > { %v1072_v11 = vpop.f32.mrb[2].mxu0 }
 0x7d6   : > { %v1073_v12 = vadd.f32 %v1072_v11, %v1002_v10  ;;  %v2509_v13 = vpop.f32.mrb[3].mxu0 }
 0x7d7   : > { %v1305_v13 = vrot.slane %v3187_v36, 5 }
 0x7d8   : > { %2789 = vtanh.f32 %v1073_v12  ;;  %v2343_v16 = vmul.f32 -1.442695, %v1073_v12 }
 0x7da   : > { %2791 = vpow2.f32 %v2343_v16 }
 0x7e2   : > { %v2790_v15 = vpop.eup %2789 }
 0x7e3   : > { %1085 = vrot.lane.b32.xlu0 %v2790_v15, %s2943_s27 }
 0x7e4   : > { %v2792_v17 = vpop.eup %2791 }
 0x7e5   : > { %v1079_v18 = vadd.f32 1.0, %v2792_v17 }
 0x7e7   : > { %2793 = vrcp.f32 %v1079_v18 }
 0x7f1   : > { %v2794_v19 = vpop.eup %2793 }
 0x7f2   : > { %v1083_v22 = vmul.f32 %v2794_v19, %v992_v5 }
 0x855   : > { %v1086_v20 = vpop.permute.xlu0 %1085 }
 0x856   : > { %v1088_v21 = vmul.f32 %v2794_v19, %v1086_v20 }
 0x858   : > { %1090 = vrot.lane.b32.xlu1 %v1088_v21, %s2943_s27 }
 0x8ca   : > { %v1091_v23 = vpop.permute.xlu1 %1090 }
 0x8cb   : > { %v1093_v24 = vadd.f32 %v1091_v23, %v1083_v22 }
 0x8cd   : > { %2795 = vtanh.f32 %v1093_v24 }
 0x8d7   : > { %v2796_v26 = vpop.eup %2795 }
 0x8d8   : > { %1096 = vrot.lane.b32.xlu0 %v2796_v26, %s2943_s27 }
 0x94a   : > { %v1097_v29 = vpop.permute.xlu0 %1096 }
 0x94b   : > { %v1099_v30 = vmul.f32 %v2794_v19, %v1097_v29 }
 0x94d   : > { %v1618_v31 = vrot.slane %v1099_v30, 6  ;;  %1101 = vrot.lane.b32.xlu1 %v1099_v30, %s3490_s24 }
 0x94f   : > { %v1633_v33 = vsel %vm1632_vm6, %v1631_v32, %v1618_v31 }
 0x9bf   : > { %v1102_v34 = vpop.permute.xlu1 %1101 }
 0x9c0   : > { %2519 = vmatmul.mubr.msk.f32.vlgmr.msra.gmra.mrb[6].mxu1 %vm791_vm4, %v1102_v34  ;;  %v1406_v34 = vrot.slane %v3187_v36, 6 }
 0x9c1   : > { %2670 = vmatpush3.bf16.msra.mxu1 %v3148_v25  ;;  %2540 = vmatprep.mubr.msk.f32.mxu1 %vm2941_vm0, %v2942_v14 }
 0x9c2   : > { %2671 = vmatprep.subr.bf16.mxu1 %v2940_v4 }
 0x9c5   : > { %2673 = vmatpush3.bf16.msra.mxu1 %v3158_v28 }
 0x9c6   : > { %2680 = vmatprep.subr.bf16.mxu1 %v2940_v4 }
 0xa93   : > { %v1173_v37 = vpop.f32.mrb[6].mxu1 }
 0xa94   : > { %v1174_v38 = vadd.f32 %v1173_v37, %v1103_v35  ;;  %v2520_v39 = vpop.f32.mrb[7].mxu1 }
 0xa96   : > { %2797 = vtanh.f32 %v1174_v38  ;;  %v2345_v41 = vmul.f32 -1.442695, %v1174_v38 }
 0xa98   : > { %2799 = vpow2.f32 %v2345_v41 }
 0xaa0   : > { %v2798_v40 = vpop.eup %2797 }
 0xaa1   : > { %1186 = vrot.lane.b32.xlu0 %v2798_v40, %s2943_s27 }
 0xaa2   : > { %v2800_v42 = vpop.eup %2799 }
 0xaa3   : > { %v1180_v43 = vadd.f32 1.0, %v2800_v42 }
 0xaa5   : > { %2801 = vrcp.f32 %v1180_v43 }
 0xaaf   : > { %v2802_v44 = vpop.eup %2801 }
 0xab0   : > { %v1184_v47 = vmul.f32 %v2802_v44, %v1093_v24 }
 0xb13   : > { %v1187_v45 = vpop.permute.xlu0 %1186 }
 0xb14   : > { %v1189_v46 = vmul.f32 %v2802_v44, %v1187_v45 }
 0xb16   : > { %1191 = vrot.lane.b32.xlu1 %v1189_v46, %s2943_s27 }
 0xb88   : > { %v1192_v48 = vpop.permute.xlu1 %1191 }
 0xb89   : > { %v1194_v49 = vadd.f32 %v1192_v48, %v1184_v47 }
 0xb8b   : > { %2803 = vtanh.f32 %v1194_v49 }
 0xb95   : > { %v2804_v50 = vpop.eup %2803 }
 0xb96   : > { %1197 = vrot.lane.b32.xlu0 %v2804_v50, %s2943_s27 }
 0xc08   : > { %v1198_v51 = vpop.permute.xlu0 %1197 }
 0xc09   : > { %v1200_v52 = vmul.f32 %v2802_v44, %v1198_v51 }
 0xc0b   : > { %v1620_v53 = vrot.slane %v1200_v52, 5  ;;  %1202 = vrot.lane.b32.xlu1 %v1200_v52, %s3490_s24 }
 0xc0d   : > { %v1635_v54 = vsel %vm1634_vm7, %v1633_v33, %v1620_v53 }
 0xc7d   : > { %v1203_v55 = vpop.permute.xlu1 %1202 }
 0xc7e   : > { %2530 = vmatmul.mubr.msk.f32.vlgmr.msra.gmra.mrb[4].mxu0 %vm791_vm4, %v1203_v55  ;;  %v1507_v55 = vrot.slane %v3187_v36, 7  ;;  %v1646_v36 = vld [vmem:[%s3472_s8] sm:$0xff] }
 0xc7f   : > { %2676 = vmatpush3.bf16.msra.mxu0 %v3148_v25  ;;  %2551 = vmatprep.mubr.msk.f32.mxu0 %vm2941_vm0, %v2942_v14 }
 0xc80   : > { %2677 = vmatprep.subr.bf16.mxu0 %v2940_v4 }
 0xc83   : > { %2679 = vmatpush3.bf16.msra.mxu0 %v3158_v28 }
 0xd51   : > { %v1274_v57 = vpop.f32.mrb[4].mxu0 }
 0xd52   : > { %v1275_v58 = vadd.f32 %v1274_v57, %v1204_v56  ;;  %v2531_v59 = vpop.f32.mrb[5].mxu0 }
 0xd54   : > { %2805 = vtanh.f32 %v1275_v58  ;;  %v2347_v61 = vmul.f32 -1.442695, %v1275_v58 }
 0xd56   : > { %2807 = vpow2.f32 %v2347_v61 }
 0xd5e   : > { %v2806_v60 = vpop.eup %2805 }
 0xd5f   : > { %1287 = vrot.lane.b32.xlu0 %v2806_v60, %s2943_s27 }
 0xd60   : > { %v2808_v62 = vpop.eup %2807 }
 0xd61   : > { %v1281_v63 = vadd.f32 1.0, %v2808_v62 }
 0xd63   : > { %2809 = vrcp.f32 %v1281_v63 }
 0xd6d   : > { %v2810_v0 = vpop.eup %2809 }
 0xd6e   : > { %v1285_v3 = vmul.f32 %v2810_v0, %v1194_v49 }
 0xdd1   : > { %v1288_v1 = vpop.permute.xlu0 %1287 }
 0xdd2   : > { %v1290_v2 = vmul.f32 %v2810_v0, %v1288_v1 }
 0xdd4   : > { %1292 = vrot.lane.b32.xlu1 %v1290_v2, %s2943_s27  ;;  %v1647_v2 = vld [vmem:[%s3472_s8 + $0x8] sm:$0xff] }
 0xe46   : > { %v1293_v5 = vpop.permute.xlu1 %1292 }
 0xe47   : > { %v1295_v6 = vadd.f32 %v1293_v5, %v1285_v3  ;;  %v2686_v3 = vpack.c.bf16 %v1647_v2, %v1646_v36  ;;  %v1648_v5 = vld [vmem:[%s3472_s8 + $0x10] sm:$0xff] }
 0xe49   : > { %2811 = vtanh.f32 %v1295_v6  ;;  %2687 = vmatprep.subr.bf16.mxu0 %v2686_v3 }
 0xe53   : > { %v2812_v7 = vpop.eup %2811 }
 0xe54   : > { %1298 = vrot.lane.b32.xlu0 %v2812_v7, %s2943_s27 }
 0xec6   : > { %v1299_v8 = vpop.permute.xlu0 %1298 }
 0xec7   : > { %v1301_v9 = vmul.f32 %v2810_v0, %v1299_v8  ;;  %v3288_v8 = vld [vmem:[%s606_s18] sm:$0xff] }
 0xec9   : > { %v1622_v10 = vrot.slane %v1301_v9, 4  ;;  %1303 = vrot.lane.b32.xlu1 %v1301_v9, %s3490_s24  ;;  %v3290_v9 = vld [vmem:[%s606_s18 + $0x8] sm:$0x3] }
 0xecb   : > { %v1637_v11 = vsel %vm1636_vm8, %v1635_v54, %v1622_v10  ;;  %v2699_v10 = vpack.c.bf16 %v3290_v9, %v3288_v8 }
 0xf3b   : > { %v1304_v12 = vpop.permute.xlu1 %1303 }
 0xf3c   : > { %2541 = vmatmul.mubr.msk.f32.vlgmr.msra.gmra.mrb[8].mxu1 %vm791_vm4, %v1304_v12 }
 0xf3d   : > { %2682 = vmatpush3.bf16.msra.mxu1 %v3148_v25  ;;  %2562 = vmatprep.mubr.msk.f32.mxu1 %vm2941_vm0, %v2942_v14 }
 0xf3e   : > { %2683 = vmatprep.subr.bf16.mxu1 %v2940_v4 }
 0xf41   : > { %2685 = vmatpush3.bf16.msra.mxu1 %v3158_v28 }
 0xf42   : > { %2694 = vmatprep.subr.bf16.mxu1 %v2940_v4 }
0x100f   : > { %v1375_v15 = vpop.f32.mrb[8].mxu1 }
0x1010   : > { %v1376_v16 = vadd.f32 %v1375_v15, %v1305_v13  ;;  %v2542_v17 = vpop.f32.mrb[9].mxu1  ;;  %v1910_v15 = vld [vmem:[%s3475_s11] sm:$0xff] }
0x1011   : > { %v1912_v17 = vld [vmem:[%s3475_s11 + $0x10] sm:$0xff] }
0x1012   : > { %2813 = vtanh.f32 %v1376_v16  ;;  %v2349_v19 = vmul.f32 -1.442695, %v1376_v16  ;;  %v1911_v16 = vld [vmem:[%s3475_s11 + $0x8] sm:$0xff] }
0x1014   : > { %2815 = vpow2.f32 %v2349_v19  ;;  %v2703_v19 = vpack.c.bf16 %v1911_v16, %v1910_v15 }
0x101c   : > { %v2814_v18 = vpop.eup %2813 }
0x101d   : > { %1388 = vrot.lane.b32.xlu0 %v2814_v18, %s2943_s27  ;;  %v1913_v18 = vld [vmem:[%s3475_s11 + $0x18] sm:$0xff] }
0x101e   : > { %v2816_v25 = vpop.eup %2815 }
0x101f   : > { %v1382_v20 = vadd.f32 1.0, %v2816_v25  ;;  %v2706_v25 = vpack.c.bf16 %v1913_v18, %v1912_v17 }
0x1021   : > { %2817 = vrcp.f32 %v1382_v20 }
0x102b   : > { %v2818_v21 = vpop.eup %2817 }
0x102c   : > { %v1386_v28 = vmul.f32 %v2818_v21, %v1295_v6  ;;  %v1649_v6 = vld [vmem:[%s3472_s8 + $0x18] sm:$0xff] }
0x102d   : > { %v2690_v7 = vpack.c.bf16 %v1649_v6, %v1648_v5 }
0x108f   : > { %v1389_v22 = vpop.permute.xlu0 %1388 }
0x1090   : > { %v1391_v23 = vmul.f32 %v2818_v21, %v1389_v22 }
0x1092   : > { %1393 = vrot.lane.b32.xlu1 %v1391_v23, %s2943_s27 }
0x1104   : > { %v1394_v24 = vpop.permute.xlu1 %1393 }
0x1105   : > { %v1396_v26 = vadd.f32 %v1394_v24, %v1386_v28 }
0x1107   : > { %2819 = vtanh.f32 %v1396_v26 }
0x1111   : > { %v2820_v27 = vpop.eup %2819 }
0x1112   : > { %1399 = vrot.lane.b32.xlu0 %v2820_v27, %s2943_s27 }
0x1184   : > { %v1400_v29 = vpop.permute.xlu0 %1399 }
0x1185   : > { %v1402_v30 = vmul.f32 %v2818_v21, %v1400_v29  ;;  %v2354_v21 = vld [vmem:[%s3473_s9] ss:$0 sm:$0xff] }
0x1187   : > { %v1624_v31 = vrot.slane %v1402_v30, 3  ;;  %1404 = vrot.lane.b32.xlu1 %v1402_v30, %s3490_s24 }
0x1189   : > { %v1639_v32 = vsel %vm1638_vm9, %v1637_v11, %v1624_v31 }
0x11f9   : > { %v1405_v33 = vpop.permute.xlu1 %1404 }
0x11fa   : > { %2552 = vmatmul.mubr.msk.f32.vlgmr.msra.gmra.mrb[6].mxu0 %vm791_vm4, %v1405_v33 }
0x11fb   : > { %2689 = vmatpush3.bf16.msra.mxu0 %v2686_v3  ;;  %2573 = vmatprep.mubr.msk.f32.mxu0 %vm791_vm4, %v3288_v8 }
0x11fc   : > { %2691 = vmatprep.subr.bf16.mxu0 %v2690_v7 }
0x11ff   : > { %2693 = vmatpush3.bf16.msra.mxu0 %v2690_v7 }
0x1200   : > { %2702 = vmatprep.subr.bf16.mxu0 %v2940_v4 }
0x1202   : > { %2574 = vmatmul.mubr.msk.f32.vlgmr.msra.gmra.mrb[8].mxu0 %vm791_vm4, %v3290_v9 }
0x1203   : > { %2598 = vmatprep.mubr.msk.f32.mxu0 %vm2941_vm0, %v2942_v14  ;;  %2704 = vmatpush3.bf16.msra.mxu0 %v2703_v19 }
0x1204   : > { %2705 = vmatprep.subr.bf16.mxu0 %v2940_v4 }
0x1207   : > { %2707 = vmatpush3.bf16.msra.mxu0 %v2706_v25 }
0x1208   : > { %2714 = vmatprep.subr.bf16.mxu0 %v2940_v4 }
0x12cd   : > { %v1476_v35 = vpop.f32.mrb[6].mxu0 }
0x12ce   : > { %v1477_v37 = vadd.f32 %v1476_v35, %v1406_v34  ;;  %v2553_v38 = vpop.f32.mrb[7].mxu0 }
0x12d0   : > { %2821 = vtanh.f32 %v1477_v37  ;;  %v2351_v40 = vmul.f32 -1.442695, %v1477_v37 }
0x12d2   : > { %2823 = vpow2.f32 %v2351_v40 }
0x12d5   : > { %v2575_v22 = vpop.f32.mrb[8].mxu0 }
0x12d6   : > { %v1735_v23 = vadd.f32 %v2575_v22, %v2354_v21  ;;  %v1729_v28 = vpop.f32.mrb[9].mxu0 }
0x12d7   : > { %v1730_v24 = vadd.f32 %v2354_v21, %v1729_v28 }
0x12da   : > { %v2822_v39 = vpop.eup %2821 }
0x12db   : > { %1489 = vrot.lane.b32.xlu0 %v2822_v39, %s2943_s27 }
0x12dc   : > { %v2824_v41 = vpop.eup %2823 }
0x12dd   : > { %v1483_v42 = vadd.f32 1.0, %v2824_v41 }
0x12df   : > { %2825 = vrcp.f32 %v1483_v42 }
0x12e9   : > { %v2826_v43 = vpop.eup %2825 }
0x12ea   : > { %v1487_v46 = vmul.f32 %v2826_v43, %v1396_v26  ;;  %v2695_v26 = vpack.c.bf16 %v1735_v23, %v1730_v24 }
0x134d   : > { %v1490_v44 = vpop.permute.xlu0 %1489 }
0x134e   : > { %v1492_v45 = vmul.f32 %v2826_v43, %v1490_v44 }
0x1350   : > { %1494 = vrot.lane.b32.xlu1 %v1492_v45, %s2943_s27 }
0x13c2   : > { %v1495_v47 = vpop.permute.xlu1 %1494 }
0x13c3   : > { %v1497_v48 = vadd.f32 %v1495_v47, %v1487_v46  ;;  %v1906_v47 = vld [vmem:[%s3474_s10] sm:$0xff] }
0x13c5   : > { %2827 = vtanh.f32 %v1497_v48 }
0x13cf   : > { %v2828_v49 = vpop.eup %2827 }
0x13d0   : > { %1500 = vrot.lane.b32.xlu0 %v2828_v49, %s2943_s27 }
0x1442   : > { %v1501_v50 = vpop.permute.xlu0 %1500 }
0x1443   : > { %v1503_v51 = vmul.f32 %v2826_v43, %v1501_v50 }
0x1445   : > { %v1626_v52 = vrot.slane %v1503_v51, 2  ;;  %1505 = vrot.lane.b32.xlu1 %v1503_v51, %s3490_s24  ;;  %s585_s24 = scalar_lea.vmem [#allocation2], %s3333_s19 }
0x1446   : > { %s2175_s20 = sshll.u32 %s585_s24, 4  ;;  %s2176_s20 = int_to_ptr.vmem [resolvable:$true] %s2175_s20 }
0x1447   : > { %v3264_v53 = vsel %vm1640_vm10, %v1639_v32, %v1626_v52  ;;  %v1908_v52 = vld [vmem:[%s3474_s10 + $0x10] sm:$0xff]  ;;  %s2843_s0 = scalar_lea.vmem %s2176_s20, 16 }
0x1448   : > { %p2844_p11 = scmp.ne.s32.totalorder %s2176_s20, %s2843_s0 }
0x144a   : > { %p2845_p12 = pnand %p2844_p11, %p3077_p5 }
0x144c   : > { %p2846_p13 = pneg %p2845_p12 }
0x14b7   : > { %v1506_v54 = vpop.permute.xlu1 %1505 }
0x14b8   : > { %2563 = vmatmul.mubr.msk.f32.vlgmr.msra.gmra.mrb[10].mxu1 %vm791_vm4, %v1506_v54 }
0x14b9   : > { %2580 = vmatprep.mubr.msk.f32.mxu1 %vm2941_vm0, %v2942_v14  ;;  %2697 = vmatpush3.bf16.xpose.msk.msra.mxu1 %vm2696_vm11, %v2695_v26 }
0x14ba   : > { %2698 = vmatprep.subr.bf16.mxu1 %v2940_v4 }
0x158b   : > { %v1577_v56 = vpop.f32.mrb[10].mxu1 }
0x158c   : > { %v1578_v57 = vadd.f32 %v1577_v56, %v1507_v55  ;;  %v2564_v58 = vpop.f32.mrb[11].mxu1 }
0x158d   : > { %v2067_v58 = vld [vmem:[%s3477_s13 + $0x8] sm:$0xff] }
0x158e   : > { %2829 = vtanh.f32 %v1578_v57  ;;  %v2353_v60 = vmul.f32 -1.442695, %v1578_v57  ;;  %v2066_v57 = vld [vmem:[%s3477_s13] sm:$0xff] }
0x1590   : > { %2831 = vpow2.f32 %v2353_v60  ;;  %v2069_v60 = vld [vmem:[%s3477_s13 + $0x18] sm:$0xff] }
0x1598   : > { %v2830_v59 = vpop.eup %2829 }
0x1599   : > { %1590 = vrot.lane.b32.xlu0 %v2830_v59, %s2943_s27  ;;  %v2715_v59 = vpack.c.bf16 %v2067_v58, %v2066_v57 }
0x159a   : > { %v2832_v61 = vpop.eup %2831 }
0x159b   : > { %v1584_v62 = vadd.f32 1.0, %v2832_v61 }
0x159d   : > { %2833 = vrcp.f32 %v1584_v62 }
0x15a7   : > { %v2834_v63 = vpop.eup %2833 }
0x15a8   : > { %v1588_v11 = vmul.f32 %v2834_v63, %v1497_v48  ;;  %v1907_v48 = vld [vmem:[%s3474_s10 + $0x8] sm:$0xff] }
0x15a9   : > { %v2709_v50 = vpack.c.bf16 %v1907_v48, %v1906_v47 }
0x160b   : > { %v1591_v0 = vpop.permute.xlu0 %1590 }
0x160c   : > { %v1593_v1 = vmul.f32 %v2834_v63, %v1591_v0 }
0x160e   : > { %1595 = vrot.lane.b32.xlu1 %v1593_v1, %s2943_s27 }
0x1680   : > { %v1596_v12 = vpop.permute.xlu1 %1595 }
0x1681   : > { %v1598_v13 = vadd.f32 %v1596_v12, %v1588_v11 }
0x1683   : > { %2835 = vtanh.f32 %v1598_v13 }
0x168d   : > { %v2836_v20 = vpop.eup %2835 }
0x168e   : > { %1601 = vrot.lane.b32.xlu0 %v2836_v20, %s2943_s27  ;;  %s3515_s27 = smov 64  }
0x1700   : > { %v1602_v27 = vpop.permute.xlu0 %1601 }
0x1701   : > { %v1604_v29 = vmul.f32 %v2834_v63, %v1602_v27  ;;  %v2364_v63 = vld [vmem:[%s3476_s12] ss:$0 sm:$0xff] }
0x1703   : > { %v1628_v30 = vrot.slane %v1604_v29, 1 }
0x1705   : > { %v1643_v31 = vsel %vm1642_vm12, %v3264_v53, %v1628_v30  ;;  %v1909_v53 = vld [vmem:[%s3474_s10 + $0x18] sm:$0xff] }
0x1706   : > { %1739 = vrot.lane.b32.xlu1 %v1643_v31, %s3515_s27  ;;  %v2712_v54 = vpack.c.bf16 %v1909_v53, %v1908_v52 }
0x1778   : > { %v1740_v32 = vpop.permute.xlu1 %1739 }
0x1779   : > { %2581 = vmatmul.mubr.msk.f32.vlgmr.msra.gmra.mrb[12].mxu1 %vm791_vm4, %v1740_v32  ;;  %2599 = vmatmul.mubr.msk.f32.vlgmr.msra.gmra.mrb[10].mxu0 %vm791_vm4, %v1740_v32 }
0x177a   : > { %2587 = vmatprep.mubr.msk.f32.mxu1 %vm2941_vm0, %v2942_v14  ;;  %2620 = vmatprep.mubr.msk.f32.mxu0 %vm2941_vm0, %v2942_v14 }
0x177b   : > { %2701 = vmatpush3.bf16.msk.msra.mxu1 %vm2700_vm2, %v2699_v10  ;;  %2716 = vmatpush3.bf16.msra.mxu0 %v2715_v59 }
0x177c   : > { %2708 = vmatprep.subr.bf16.mxu1 %v2940_v4  ;;  %2717 = vmatprep.subr.bf16.mxu0 %v2940_v4 }
0x184c   : > { %v1815_v33 = vpop.f32.mrb[12].mxu1  ;;  %v1980_v34 = vpop.f32.mrb[10].mxu0 }
0x184d   : > { %v2582_v35 = vpop.f32.mrb[13].mxu1  ;;  %v2600_v37 = vpop.f32.mrb[11].mxu0  ;;  %v1820_v38 = vsel %vm1819_vm13, %v1815_v33, -inf }
0x184e   : > { %1821 = vmax.xlane.f32.xlu0 %v1820_v38 }
0x1864   : > { %1606 = vrot.lane.b32.xlu0 %v1604_v29, %s3515_s27  ;;  %s3391_s27 = scalar_lea.hbm %s3480_s16, %s3493_s29 }
0x18db   : > { %v1822_v39 = vpop.xlane.xlu0 %1821 }
0x18dc   : > { %v1823_v40 = vsub.f32 %v1815_v33, %v1822_v39 }
0x18de   : > { %v1824_v41 = vmul.f32 1.442695, %v1823_v40 }
0x18df   : > { %v1607_v42 = vpop.permute.xlu0 %1606 }
0x18e0   : > { %2837 = vpow2.f32 %v1824_v41  ;;  %1610 = vst.msk [vmem:[%s585_s24] sm:$0x1] %vm1609_vm14, %v1607_v42 }
0x18ea   : > { %v2838_v43 = vpop.eup %2837 }
0x18eb   : > { %v1826_v44 = vsel %vm1819_vm13, %v2838_v43, 0.0 }
0x18ec   : > { %1827 = vadd.xlane.f32.xlu1 %v1826_v44 }
0x18fd   : > { %1612 = vrot.lane.b32.xlu1 %v1598_v13, %s2945_s15  ;;  %s2156_s15 = scalar_lea.sflag [#allocation3], %s3333_s19 }
0x1979   : > { %v1828_v45 = vpop.xlane.xlu1 %1827 }
0x197a   : > { %2839 = vrcp.f32 %v1828_v45 }
0x197d   : > { %v1613_v46 = vpop.permute.xlu1 %1612 }
0x197e   : > { %1615 = vst.msk [vmem:[%s3492_s26] sm:$0x1] %vm1609_vm14, %v1613_v46  ;;  %s2847_s26 = sshll.u32 %s2947_s22, 4  ;;  %s2848_s26 = int_to_ptr.vmem [resolvable:$false] %s2847_s26 }
0x197f   : > { %s2849_s2 = scalar_lea.vmem %s2848_s26, 32  ;;  %p2850_p0 = scmp.lt.s32.totalorder %s2176_s20, %s2848_s26 }
0x1980   : > { %p2851_p1 = scmp.lt.s32.totalorder %s2849_s2, %s2843_s0 }
0x1982   : > { %p2852_p2 = por %p2851_p1, %p2850_p0 }
0x1984   : > { %v2840_v49 = vpop.eup %2839  ;;  %p2853_p3 = pnand %p2852_p2, %p2846_p13 }
0x1985   : > { %v1830_v51 = vmul.f32 %v2840_v49, %v2838_v43 }
0x1987   : > { %2588 = vmatmul.mubr.msk.f32.vlgmr.msra.gmra.mrb[14].mxu1 %vm1819_vm13, %v1830_v51 }
0x1988   : > { %2710 = vmatpush3.bf16.msra.mxu1 %v2709_v50  ;;  %2609 = vmatprep.mubr.msk.f32.mxu1 %vm2941_vm0, %v2942_v14  ;;  %v2068_v14 = vld [vmem:[%s3477_s13 + $0x10] sm:$0xff] }
0x1989   : > { %2711 = vmatprep.subr.bf16.mxu1 %v2940_v4  ;;  %v2718_v61 = vpack.c.bf16 %v2069_v60, %v2068_v14 }
0x198b   : > { %2719 = vmatpush3.bf16.msra.mxu0 %v2718_v61 }
0x198c   : > { %2713 = vmatpush3.bf16.msra.mxu1 %v2712_v54 }
0x1a5a   : > { %v1902_v55 = vpop.f32.mrb[14].mxu1 }
0x1a5b   : > { %v2589_v56 = vpop.f32.mrb[15].mxu1  ;;  %2610 = vmatmul.mubr.msk.f32.vlgmr.msra.gmra.mrb[16].mxu1 %vm791_vm4, %v1902_v55 }
0x1b2e   : > { %v2053_v62 = vpop.f32.mrb[16].mxu1 }
0x1b2f   : > { %v2054_v0 = vadd.f32 %v2053_v62, %v1980_v34  ;;  %v2611_v1 = vpop.f32.mrb[17].mxu1 }
0x1b31   : > { %v2064_v36 = vadd.f32 %v2364_v63, %v2054_v0 }
0x1b33   : > { %2841 = vtanh.f32 %v2064_v36 }
0x1b3d   : > { %v2842_v2 = vpop.eup %2841 }
0x1b3e   : > { %2621 = vmatmul.mubr.msk.f32.vlgmr.msra.gmra.mrb[12].mxu0 %vm791_vm4, %v2842_v2 }
0x1b3f   : > { %2856 = shalt.err (!%p2853_p3)
}
0x1b40   : > { %s2857_s24 = scalar_lea.hbm %s3391_s27, 16  ;;  %s2861_s22 = scalar_lea.hbm %s3480_s16, 32 }
0x1b41   : > { %p2858_p4 = scmp.ne.s32.totalorder %s3391_s27, %s2857_s24  ;;  %p2862_p9 = scmp.lt.u32.totalorder %s3391_s27, %s3480_s16 }
0x1b42   : > { %p2863_p10 = scmp.lt.u32.totalorder %s2861_s22, %s2857_s24  ;;  %p2865_p12 = scmp.lt.u32.totalorder %s2857_s24, %s3391_s27 }
0x1b43   : > { %p2859_p7 = pnand %p2858_p4, %p3077_p5 }
0x1b44   : > { %p2864_p11 = por %p2863_p10, %p2862_p9 }
0x1b45   : > { %p2860_p8 = pneg %p2859_p7 }
0x1b46   : > { %p2866_p13 = por %p2865_p12, %p2864_p11 }
0x1b48   : > { %p2867_p0 = pnand %p2866_p13, %p2860_p8 }
0x1b4a   : > { %2870 = shalt.err (!%p2867_p0)
}
0x1b4b   : > { %2720 = dma.vmem_to_hbm [thread:$0]  (%p3077_p5), %s2176_s20, 16, %s3391_s27, %s2156_s15  }
0x1b4c   : > { %s3516_s2 = sshll.u32 %s3060_s28, 4  ;;  %s3517_s18 = scalar_lea.vmem [#allocation4], %s3333_s19 }
0x1b4d   : > { %s3416_s29 = scalar_lea.hbm %s3481_s17, %s3516_s2  ;;  %s2188_s22 = sshll.u32 %s3517_s18, 4  ;;  %s2189_s22 = int_to_ptr.vmem [resolvable:$true] %s2188_s22 }
0x1b4e   : > { %s2160_s24 = scalar_lea.sflag [#allocation5], %s3333_s19  ;;  %s2871_s26 = scalar_lea.vmem %s2189_s22, 16 }
0x1b4f   : > { %p2872_p1 = scmp.ne.s32.totalorder %s2189_s22, %s2871_s26  ;;  %s2948_s3 = smov [#allocation4]  }
0x1b50   : > { %s2875_s4 = sshll.u32 %s2948_s3, 4  ;;  %s2876_s4 = int_to_ptr.vmem [resolvable:$false] %s2875_s4 }
0x1b51   : > { %p2873_p2 = pnand %p2872_p1, %p3077_p5  ;;  %s2877_s5 = scalar_lea.vmem %s2876_s4, 32 }
0x1b52   : > { %p2878_p4 = scmp.lt.s32.totalorder %s2189_s22, %s2876_s4  ;;  %p2879_p7 = scmp.lt.s32.totalorder %s2877_s5, %s2871_s26 }
0x1b53   : > { %p2874_p3 = pneg %p2873_p2 }
0x1b54   : > { %p2880_p8 = por %p2879_p7, %p2878_p4 }
0x1b56   : > { %p2881_p9 = pnand %p2880_p8, %p2874_p3 }
0x1b58   : > { %2884 = shalt.err (!%p2881_p9)
}
0x1b59   : > { %s2885_s28 = scalar_lea.hbm %s3416_s29, 16  ;;  %s2889_s3 = scalar_lea.hbm %s3481_s17, 32 }
0x1b5a   : > { %p2886_p10 = scmp.ne.s32.totalorder %s3416_s29, %s2885_s28  ;;  %p2890_p13 = scmp.lt.u32.totalorder %s3416_s29, %s3481_s17 }
0x1b5b   : > { %p2891_p0 = scmp.lt.u32.totalorder %s2889_s3, %s2885_s28  ;;  %p2893_p2 = scmp.lt.u32.totalorder %s2885_s28, %s3416_s29 }
0x1b5c   : > { %p2887_p11 = pnand %p2886_p10, %p3077_p5 }
0x1b5d   : > { %p2892_p1 = por %p2891_p0, %p2890_p13 }
0x1b5e   : > { %p2888_p12 = pneg %p2887_p11 }
0x1b5f   : > { %p2894_p3 = por %p2893_p2, %p2892_p1 }
0x1b61   : > { %p2895_p4 = pnand %p2894_p3, %p2888_p12 }
0x1b63   : > { %2898 = shalt.err (!%p2895_p4)
}
0x1b64   : > { %2721 = dma.vmem_to_hbm [thread:$0]  (%p3077_p5), %s2189_s22, 16, %s3416_s29, %s2160_s24   ;;  %v2365_v4 = vld [vmem:[%s3478_s14] ss:$0 sm:$0xff] }
0x1b65   : > { %s3518_s2 = sshll.u32 %s3102_s21, 3  ;;  %s3519_s18 = sld [smem:[#allocation20_spill]] }
0x1b6b   : > { %s610_s26 = scalar_lea.vmem %s3519_s18, %s3518_s2 }
0x1c11   : > { %v2146_v3 = vpop.f32.mrb[12].mxu0 }
0x1c12   : > { %v2147_v5 = vadd.f32 %v2365_v4, %v2146_v3  ;;  %v2622_v6 = vpop.f32.mrb[13].mxu0 }
0x1c14   : > { %2150 = vst.msk [vmem:[%s610_s26] sm:$0xff] %vm628_vm1, %v2147_v5 }
0x1c15 PF: > { %s3520_s28 = sld [smem:[#allocation10_spill]]  ;;  %s3521_s1 = sld [smem:[#allocation8_spill]] }
0x1c1b   : > { %p2731_p7 = scmp.ge.s32.totalorder %s3520_s28, 2  ;;  %s2207_s29 = sand.u32 1, %s3521_s1  }
0x1c1c   : > { %s2208_s22 = scalar_lea.sflag [#allocation3], %s2207_s29 }
0x1c1d   : > { %p2725_p5 = pnand %p2731_p7, %p3081_p6 }
0x1c1f   : > { %2916 = dma.done.wait (!%p2725_p5), %s2208_s22, 16  }
0x1c20   : > { %2918 = vsyncadd (!%p2725_p5), %s2208_s22, 4294967280  ;;  %s2216_s21 = scalar_lea.sflag [#allocation5], %s2207_s29 }
0x1c21   : > { %2920 = dma.done.wait (!%p2725_p5), %s2216_s21, 16  }
0x1c22   : > { %2922 = vsyncadd (!%p2725_p5), %s2216_s21, 4294967280  ;;  %s3523_s27 = sld [smem:[#allocation11_spill]]  ;;  %s3524_s20 = sld [smem:[#allocation9_spill]] }
0x1c23   : > { %s3525_s26 = sld [smem:[#allocation12_spill]]  ;;  %s3526_s24 = smov %s2929_s25 }
0x1c28   : > { %p31_p8 = scmp.ge.s32.totalorder %s3523_s27, 4   ;;  %s3527_s25 = smov %s3524_s20 }
0x1c2a   :  { %33 = sbr.rel (!%p31_p8) target bundleno = 13 (0xd), region = 153 }
0x1c31   :  { %2220 = vsyncpa [#allocation3], 1 }
0x1c32   :  { %2222 = vsyncpa [#allocation3 + $0x1], 1 }
0x1c33   :  { %2223 = vsyncpa [#allocation5], 1 }
0x1c34   :  { %2225 = vsyncpa [#allocation5 + $0x1], 1 }

</bundles_post_ra>
